<compile_context>
chip_gen: v7x
topology: tpu7x:2x2x1
jax: 0.10.0
libtpu: 0.0.40
codegen_flags: <defaults>
</compile_context>

<pallas_src>
import numpy as np
import jax
import jax.numpy as jnp
from jax import lax
from jax.experimental import pallas as pl
from jax.experimental.pallas import tpu as pltpu


def _use_bf16_mxu_path():
    """bf16 tap staging + single K-stacked MXU matmul on v6e/v7x; f32
    register-accumulate elsewhere (v5e has no bf16 VPU and a single vst slot)."""
    try:
        kind = jax.devices()[0].device_kind.lower()
    except Exception:
        return False
    return ("v6" in kind) or ("v7" in kind) or ("tpu7" in kind)


def _make_kernel(D, H, W, F, HP, HALO, stacked, tap_dtype):
    S = D * H * W
    HW = H * W

    def kernel(x_ref, wbf_ref, bbf_ref, wt_ref, bh_ref, mask_ref,
               out_ref, pad_ref, *stk):
        x = x_ref[0].astype(jnp.float32)                       # (Cin, S)

        # --- backbone stub (1x1x1 conv) with eval-BN folded, then ReLU (f32) ---
        feat = jnp.dot(wbf_ref[...], x,
                       preferred_element_type=jnp.float32) + bbf_ref[...]
        feat = jnp.maximum(feat, 0.0)                          # (F, S)

        # --- halo-padded staging (f32).  Only the two lane-aligned halos are
        # zeroed; the interior is fully overwritten every iteration (required
        # for correctness under "parallel" batch semantics / per-core scratch).
        zhalo = jnp.zeros((F, HALO), jnp.float32)
        pad_ref[:, 0:HALO] = zhalo
        pad_ref[:, HALO + S:S + 2 * HALO] = zhalo
        pad_ref[:, HALO:HALO + S] = feat

        def tap(kd, kh, kw):
            if kd == 1 and kh == 1 and kw == 1:
                return feat                                    # center: reuse regs
            off = (kd - 1) * HW + (kh - 1) * W + (kw - 1)
            t = pad_ref[:, HALO + off:HALO + off + S]
            if not (kh == 1 and kw == 1):
                # (kh,kw)-plane mask only; D-boundary is covered by the halo.
                t = t * mask_ref[kh * 3 + kw]
            return t

        if stacked:
            # im2col: stack all 27 masked taps (bf16) and do ONE MXU matmul
            # with the heads already folded into the tap weights.
            stk_ref = stk[0]
            for kd in range(3):
                for kh in range(3):
                    for kw in range(3):
                        k = kd * 9 + kh * 3 + kw
                        stk_ref[k * F:(k + 1) * F, :] = (
                            tap(kd, kh, kw).astype(tap_dtype))
            out = jnp.dot(wt_ref[...], stk_ref[...],
                          preferred_element_type=jnp.float32) + bh_ref[...]
        else:
            # register-accumulate: 27 small dots (best on v5e, single vst slot)
            out = jnp.dot(wt_ref[13], feat,
                          preferred_element_type=jnp.float32)  # center tap
            for kd in range(3):
                for kh in range(3):
                    for kw in range(3):
                        if kd == 1 and kh == 1 and kw == 1:
                            continue
                        k = kd * 9 + kh * 3 + kw
                        out = out + jnp.dot(wt_ref[k], tap(kd, kh, kw),
                                            preferred_element_type=jnp.float32)
            out = out + bh_ref[...]

        out_ref[0] = out.astype(out_ref.dtype)

    return kernel


def _plane_masks(D, H, W):
    """Host constant: 9 (kh,kw) validity masks in the flattened layout.
    D-boundary invalidity is handled by the zeroed halo, so only the H/W plane
    masks are needed (3x smaller than the old 27-tap mask set)."""
    S = D * H * W
    h_idx, w_idx = np.meshgrid(np.arange(H), np.arange(W), indexing='ij')
    masks = np.zeros((9, 1, S), np.float32)
    for oh in (-1, 0, 1):
        for ow in (-1, 0, 1):
            ok = ((h_idx + oh >= 0) & (h_idx + oh < H) &
                  (w_idx + ow >= 0) & (w_idx + ow < W))
            plane = ok.reshape(-1).astype(np.float32)          # (H*W,)
            masks[(oh + 1) * 3 + (ow + 1), 0, :] = np.tile(plane, D)
    return masks


def basic_unet_forward(x, params):
    """x: (N, Cin, D, H, W) NCDHW float32. Returns (coarse, fine) NCDHW."""
    (wb, bb, bn_gamma, bn_beta, bn_mean, bn_var,
     w3_oidhw, b3, wc, bc, wf, bf) = params
    N, Cin, D, H, W = x.shape
    S = D * H * W
    F = wb.shape[0]
    n_coarse, n_fine = wc.shape[0], wf.shape[0]
    n_heads = n_coarse + n_fine
    HP = ((n_heads + 7) // 8) * 8            # pad head rows -> full-vreg stores
    PADF = H * W + W + 1                     # max |flattened shift| of a 3^3 tap
    HALO = ((PADF + 127) // 128) * 128       # lane-aligned halo width

    stacked = _use_bf16_mxu_path()
    tap_dtype = jnp.bfloat16 if stacked else jnp.float32

    hp = lax.Precision.HIGHEST

    # --- constant folding (all wrapper-side, zero kernel cost) ---
    eps = 1e-5
    bns = bn_gamma / jnp.sqrt(bn_var + eps)
    wbf = bns[:, None] * wb                              # (F, Cin) BN-folded 1x1x1
    bbf = bns * bb + (bn_beta - bn_mean * bns)           # (F,)

    wh = jnp.concatenate([wc, wf], axis=0)               # (n_heads, F)
    bh = (jnp.concatenate([bc, bf], axis=0)
          + jnp.einsum('hf,f->h', wh, b3, precision=hp)) # Conv3d bias folded
    w3_flat = jnp.transpose(w3_oidhw, (2, 3, 4, 0, 1)).reshape(27, F, F)
    wh3 = jnp.einsum('hf,kfg->khg', wh, w3_flat, precision=hp)  # head->tap fold
    wh3 = jnp.pad(wh3, ((0, 0), (0, HP - n_heads), (0, 0)))     # (27, HP, F)
    bh_c = jnp.pad(bh, (0, HP - n_heads)).reshape(HP, 1)
    bbf_c = bbf.reshape(F, 1)

    if stacked:
        # single-matmul layout: wt[h, k*F + g] = wh3[k, h, g]
        wt = jnp.transpose(wh3, (1, 0, 2)).reshape(HP, 27 * F).astype(tap_dtype)
    else:
        wt = wh3                                          # (27, HP, F) f32

    masks = jnp.asarray(_plane_masks(D, H, W))            # (9, 1, S) f32 constant
    x_flat = x.reshape(N, Cin, S)

    full = lambda a: pl.BlockSpec(a.shape, lambda n, _nd=a.ndim: (0,) * _nd)
    scratch = [pltpu.VMEM((F, S + 2 * HALO), jnp.float32)]
    if stacked:
        scratch.append(pltpu.VMEM((27 * F, S), tap_dtype))

    kernel = _make_kernel(D, H, W, F, HP, HALO, stacked, tap_dtype)
    out_flat = pl.pallas_call(
        kernel,
        out_shape=jax.ShapeDtypeStruct((N, HP, S), x.dtype),
        grid=(N,),
        in_specs=[pl.BlockSpec((1, Cin, S), lambda n: (n, 0, 0)),
                  full(wbf), full(bbf_c), full(wt), full(bh_c), full(masks)],
        out_specs=pl.BlockSpec((1, HP, S), lambda n: (n, 0, 0)),
        scratch_shapes=scratch,
        compiler_params=pltpu.CompilerParams(
            dimension_semantics=("parallel",)),
    )(x_flat, wbf, bbf_c, wt, bh_c, masks)

    out = out_flat.reshape(N, HP, D, H, W)
    return out[:, :n_coarse], out[:, n_coarse:n_heads]


def ref_forward(x, params):
    """Pure-JAX reference (same semantics as the PyTorch forward, eval BN)."""
    (wb, bb, bn_gamma, bn_beta, bn_mean, bn_var,
     w3, b3, wc, bc, wf, bf) = params
    eps = 1e-5
    hp = lax.Precision.HIGHEST
    bcast = lambda v: v[None, :, None, None, None]
    feat = jnp.einsum('ncdhw,fc->nfdhw', x, wb, precision=hp) + bcast(bb)
    scale = bn_gamma / jnp.sqrt(bn_var + eps)
    shift = bn_beta - bn_mean * scale
    feat = feat * bcast(scale) + bcast(shift)
    feat = jnp.maximum(feat, 0.0)
    conv = lax.conv_general_dilated(
        feat, w3, window_strides=(1, 1, 1),
        padding=((1, 1), (1, 1), (1, 1)),
        dimension_numbers=('NCDHW', 'OIDHW', 'NCDHW'),
        precision=hp) + bcast(b3)
    coarse = jnp.einsum('ncdhw,oc->nodhw', conv, wc, precision=hp) + bcast(bc)
    fine = jnp.einsum('ncdhw,oc->nodhw', conv, wf, precision=hp) + bcast(bf)
    return coarse, fine


if __name__ == "__main__":
    key = jax.random.PRNGKey(0)
    ks = jax.random.split(key, 16)

    # small shapes consistent with the module: 3-D volumetric input NCDHW
    N, Cin, D, H, W = 2, 4, 8, 8, 8
    F = 8                      # backbone.out_ch
    n_coarse, n_fine = 2, 4

    x = jax.random.normal(ks[0], (N, Cin, D, H, W), jnp.float32)

    # deterministic synthetic parameters (shapes per the module __init__)
    wb = 0.3 * jax.random.normal(ks[1], (F, Cin), jnp.float32)       # backbone 1x1x1
    bb = 0.1 * jax.random.normal(ks[2], (F,), jnp.float32)
    bn_gamma = 1.0 + 0.1 * jax.random.normal(ks[3], (F,), jnp.float32)
    bn_beta = 0.1 * jax.random.normal(ks[4], (F,), jnp.float32)
    bn_mean = 0.1 * jax.random.normal(ks[5], (F,), jnp.float32)
    bn_var = 1.0 + 0.1 * jnp.abs(jax.random.normal(ks[6], (F,), jnp.float32))
    w3 = 0.1 * jax.random.normal(ks[7], (F, F, 3, 3, 3), jnp.float32)  # Conv3d k=3
    b3 = 0.05 * jax.random.normal(ks[8], (F,), jnp.float32)
    wc = 0.3 * jax.random.normal(ks[9], (n_coarse, F), jnp.float32)    # coarse head
    bc = 0.05 * jax.random.normal(ks[10], (n_coarse,), jnp.float32)
    wf = 0.3 * jax.random.normal(ks[11], (n_fine, F), jnp.float32)     # fine head
    bf = 0.05 * jax.random.normal(ks[12], (n_fine,), jnp.float32)

    params = (wb, bb, bn_gamma, bn_beta, bn_mean, bn_var,
              w3, b3, wc, bc, wf, bf)

    coarse, fine = jax.jit(basic_unet_forward)(x, params)
    jax.block_until_ready((coarse, fine))

    assert coarse.shape == (N, n_coarse, D, H, W)
    assert fine.shape == (N, n_fine, D, H, W)

    c_ref, f_ref = ref_forward(x, params)
    np.testing.assert_allclose(np.asarray(coarse), np.asarray(c_ref),
                               rtol=2e-2, atol=2e-2)
    np.testing.assert_allclose(np.asarray(fine), np.asarray(f_ref),
                               rtol=2e-2, atol=2e-2)
    print("KERNEL_OK")
</pallas_src>

<mosaic_0001>
module attributes {stable_mosaic.version = 11 : i64} {
  func.func @kernel(%arg0: i32, %arg1: memref<1x4x512xf32, #tpu.memory_space<vmem>>, %arg2: memref<8x4xf32, #tpu.memory_space<vmem>>, %arg3: memref<8x1xf32, #tpu.memory_space<vmem>>, %arg4: memref<27x8x8xf32, #tpu.memory_space<vmem>>, %arg5: memref<8x1xf32, #tpu.memory_space<vmem>>, %arg6: memref<9x1x512xf32, #tpu.memory_space<vmem>>, %arg7: memref<1x8x512xf32, #tpu.memory_space<vmem>>, %arg8: memref<8x768xf32, #tpu.memory_space<vmem>>) attributes {dimension_semantics = [#tpu.dimension_semantics<parallel>], iteration_bounds = array<i64: 2>, scalar_prefetch = 0 : i64, scratch_operands = 1 : i64, tpu.core_type = #tpu.core_type<tc>, window_params = [{transform_indices = @transform_0, window_bounds = array<i64: 1, 4, 512>}, {pipeline_mode = #tpu.pipeline_mode<synchronous>, transform_indices = @transform_1, window_bounds = array<i64: 8, 4>}, {pipeline_mode = #tpu.pipeline_mode<synchronous>, transform_indices = @transform_2, window_bounds = array<i64: 8, 1>}, {pipeline_mode = #tpu.pipeline_mode<synchronous>, transform_indices = @transform_3, window_bounds = array<i64: 27, 8, 8>}, {pipeline_mode = #tpu.pipeline_mode<synchronous>, transform_indices = @transform_4, window_bounds = array<i64: 8, 1>}, {pipeline_mode = #tpu.pipeline_mode<synchronous>, transform_indices = @transform_5, window_bounds = array<i64: 9, 1, 512>}, {transform_indices = @transform_6, window_bounds = array<i64: 1, 8, 512>}]} {
    %c0 = arith.constant 0 : index
    %c0_0 = arith.constant 0 : index
    %c0_1 = arith.constant 0 : index
    %0 = vector.load %arg1[%c0, %c0_0, %c0_1] : memref<1x4x512xf32, #tpu.memory_space<vmem>>, vector<1x4x512xf32>
    %1 = vector.shape_cast %0 : vector<1x4x512xf32> to vector<4x512xf32>
    %c0_2 = arith.constant 0 : index
    %c0_3 = arith.constant 0 : index
    %2 = vector.load %arg2[%c0_2, %c0_3] : memref<8x4xf32, #tpu.memory_space<vmem>>, vector<8x4xf32>
    %cst = arith.constant dense<0.000000e+00> : vector<8x512xf32>
    %3 = tpu.matmul %2, %1, %cst {dimension_numbers = #tpu.dot_dimension_numbers<[1], [0], [0], [1], [0, 0, 1, 1], [], []>} : vector<8x4xf32>, vector<4x512xf32>, vector<8x512xf32> -> vector<8x512xf32>
    %c0_4 = arith.constant 0 : index
    %c0_5 = arith.constant 0 : index
    %4 = vector.load %arg3[%c0_4, %c0_5] : memref<8x1xf32, #tpu.memory_space<vmem>>, vector<8x1xf32>
    %5 = vector.broadcast %4 : vector<8x1xf32> to vector<8x512xf32>
    %6 = arith.addf %3, %5 : vector<8x512xf32>
    %cst_6 = arith.constant 0.000000e+00 : f32
    %7 = vector.broadcast %cst_6 : f32 to vector<8x512xf32>
    %8 = arith.maximumf %6, %7 : vector<8x512xf32>
    %cst_7 = arith.constant 0.000000e+00 : f32
    %9 = vector.broadcast %cst_7 : f32 to vector<8x128xf32>
    %c0_8 = arith.constant 0 : index
    %c0_9 = arith.constant 0 : index
    %10 = vector.load %arg8[%c0_8, %c0_9] : memref<8x768xf32, #tpu.memory_space<vmem>>, vector<8x128xf32>
    tpu.vector_store %arg8[%c0_8, %c0_9], %9 {strides = array<i32>} : memref<8x768xf32, #tpu.memory_space<vmem>>, vector<8x128xf32>,
    %c0_10 = arith.constant 0 : index
    %c640 = arith.constant 640 : index
    %11 = vector.load %arg8[%c0_10, %c640] : memref<8x768xf32, #tpu.memory_space<vmem>>, vector<8x128xf32>
    tpu.vector_store %arg8[%c0_10, %c640], %9 {strides = array<i32>} : memref<8x768xf32, #tpu.memory_space<vmem>>, vector<8x128xf32>,
    %c0_11 = arith.constant 0 : index
    %c128 = arith.constant 128 : index
    %12 = vector.load %arg8[%c0_11, %c128] : memref<8x768xf32, #tpu.memory_space<vmem>>, vector<8x512xf32>
    tpu.vector_store %arg8[%c0_11, %c128], %8 {strides = array<i32>} : memref<8x768xf32, #tpu.memory_space<vmem>>, vector<8x512xf32>,
    %c13 = arith.constant 13 : index
    %c0_12 = arith.constant 0 : index
    %c0_13 = arith.constant 0 : index
    %13 = vector.load %arg4[%c13, %c0_12, %c0_13] : memref<27x8x8xf32, #tpu.memory_space<vmem>>, vector<1x8x8xf32>
    %14 = vector.shape_cast %13 : vector<1x8x8xf32> to vector<8x8xf32>
    %cst_14 = arith.constant dense<0.000000e+00> : vector<8x512xf32>
    %15 = tpu.matmul %14, %8, %cst_14 {dimension_numbers = #tpu.dot_dimension_numbers<[1], [0], [0], [1], [0, 0, 1, 1], [], []>} : vector<8x8xf32>, vector<8x512xf32>, vector<8x512xf32> -> vector<8x512xf32>
    %c0_15 = arith.constant 0 : index
    %c0_16 = arith.constant 0 : index
    %c0_17 = arith.constant 0 : index
    %16 = vector.load %arg4[%c0_15, %c0_16, %c0_17] : memref<27x8x8xf32, #tpu.memory_space<vmem>>, vector<1x8x8xf32>
    %17 = vector.shape_cast %16 : vector<1x8x8xf32> to vector<8x8xf32>
    %c0_18 = arith.constant 0 : index
    %c55 = arith.constant 55 : index
    %18 = vector.load %arg8[%c0_18, %c55] : memref<8x768xf32, #tpu.memory_space<vmem>>, vector<8x512xf32>
    %c0_19 = arith.constant 0 : index
    %c0_20 = arith.constant 0 : index
    %c0_21 = arith.constant 0 : index
    %19 = vector.load %arg6[%c0_19, %c0_20, %c0_21] : memref<9x1x512xf32, #tpu.memory_space<vmem>>, vector<1x1x512xf32>
    %20 = vector.shape_cast %19 : vector<1x1x512xf32> to vector<1x512xf32>
    %21 = vector.broadcast %20 : vector<1x512xf32> to vector<8x512xf32>
    %22 = arith.mulf %18, %21 : vector<8x512xf32>
    %cst_22 = arith.constant dense<0.000000e+00> : vector<8x512xf32>
    %23 = tpu.matmul %17, %22, %cst_22 {dimension_numbers = #tpu.dot_dimension_numbers<[1], [0], [0], [1], [0, 0, 1, 1], [], []>} : vector<8x8xf32>, vector<8x512xf32>, vector<8x512xf32> -> vector<8x512xf32>
    %24 = arith.addf %15, %23 : vector<8x512xf32>
    %c1 = arith.constant 1 : index
    %c0_23 = arith.constant 0 : index
    %c0_24 = arith.constant 0 : index
    %25 = vector.load %arg4[%c1, %c0_23, %c0_24] : memref<27x8x8xf32, #tpu.memory_space<vmem>>, vector<1x8x8xf32>
    %26 = vector.shape_cast %25 : vector<1x8x8xf32> to vector<8x8xf32>
    %c0_25 = arith.constant 0 : index
    %c56 = arith.constant 56 : index
    %27 = vector.load %arg8[%c0_25, %c56] : memref<8x768xf32, #tpu.memory_space<vmem>>, vector<8x512xf32>
    %c1_26 = arith.constant 1 : index
    %c0_27 = arith.constant 0 : index
    %c0_28 = arith.constant 0 : index
    %28 = vector.load %arg6[%c1_26, %c0_27, %c0_28] : memref<9x1x512xf32, #tpu.memory_space<vmem>>, vector<1x1x512xf32>
    %29 = vector.shape_cast %28 : vector<1x1x512xf32> to vector<1x512xf32>
    %30 = vector.broadcast %29 : vector<1x512xf32> to vector<8x512xf32>
    %31 = arith.mulf %27, %30 : vector<8x512xf32>
    %cst_29 = arith.constant dense<0.000000e+00> : vector<8x512xf32>
    %32 = tpu.matmul %26, %31, %cst_29 {dimension_numbers = #tpu.dot_dimension_numbers<[1], [0], [0], [1], [0, 0, 1, 1], [], []>} : vector<8x8xf32>, vector<8x512xf32>, vector<8x512xf32> -> vector<8x512xf32>
    %33 = arith.addf %24, %32 : vector<8x512xf32>
    %c2 = arith.constant 2 : index
    %c0_30 = arith.constant 0 : index
    %c0_31 = arith.constant 0 : index
    %34 = vector.load %arg4[%c2, %c0_30, %c0_31] : memref<27x8x8xf32, #tpu.memory_space<vmem>>, vector<1x8x8xf32>
    %35 = vector.shape_cast %34 : vector<1x8x8xf32> to vector<8x8xf32>
    %c0_32 = arith.constant 0 : index
    %c57 = arith.constant 57 : index
    %36 = vector.load %arg8[%c0_32, %c57] : memref<8x768xf32, #tpu.memory_space<vmem>>, vector<8x512xf32>
    %c2_33 = arith.constant 2 : index
    %c0_34 = arith.constant 0 : index
    %c0_35 = arith.constant 0 : index
    %37 = vector.load %arg6[%c2_33, %c0_34, %c0_35] : memref<9x1x512xf32, #tpu.memory_space<vmem>>, vector<1x1x512xf32>
    %38 = vector.shape_cast %37 : vector<1x1x512xf32> to vector<1x512xf32>
    %39 = vector.broadcast %38 : vector<1x512xf32> to vector<8x512xf32>
    %40 = arith.mulf %36, %39 : vector<8x512xf32>
    %cst_36 = arith.constant dense<0.000000e+00> : vector<8x512xf32>
    %41 = tpu.matmul %35, %40, %cst_36 {dimension_numbers = #tpu.dot_dimension_numbers<[1], [0], [0], [1], [0, 0, 1, 1], [], []>} : vector<8x8xf32>, vector<8x512xf32>, vector<8x512xf32> -> vector<8x512xf32>
    %42 = arith.addf %33, %41 : vector<8x512xf32>
    %c3 = arith.constant 3 : index
    %c0_37 = arith.constant 0 : index
    %c0_38 = arith.constant 0 : index
    %43 = vector.load %arg4[%c3, %c0_37, %c0_38] : memref<27x8x8xf32, #tpu.memory_space<vmem>>, vector<1x8x8xf32>
    %44 = vector.shape_cast %43 : vector<1x8x8xf32> to vector<8x8xf32>
    %c0_39 = arith.constant 0 : index
    %c63 = arith.constant 63 : index
    %45 = vector.load %arg8[%c0_39, %c63] : memref<8x768xf32, #tpu.memory_space<vmem>>, vector<8x512xf32>
    %c3_40 = arith.constant 3 : index
    %c0_41 = arith.constant 0 : index
    %c0_42 = arith.constant 0 : index
    %46 = vector.load %arg6[%c3_40, %c0_41, %c0_42] : memref<9x1x512xf32, #tpu.memory_space<vmem>>, vector<1x1x512xf32>
    %47 = vector.shape_cast %46 : vector<1x1x512xf32> to vector<1x512xf32>
    %48 = vector.broadcast %47 : vector<1x512xf32> to vector<8x512xf32>
    %49 = arith.mulf %45, %48 : vector<8x512xf32>
    %cst_43 = arith.constant dense<0.000000e+00> : vector<8x512xf32>
    %50 = tpu.matmul %44, %49, %cst_43 {dimension_numbers = #tpu.dot_dimension_numbers<[1], [0], [0], [1], [0, 0, 1, 1], [], []>} : vector<8x8xf32>, vector<8x512xf32>, vector<8x512xf32> -> vector<8x512xf32>
    %51 = arith.addf %42, %50 : vector<8x512xf32>
    %c4 = arith.constant 4 : index
    %c0_44 = arith.constant 0 : index
    %c0_45 = arith.constant 0 : index
    %52 = vector.load %arg4[%c4, %c0_44, %c0_45] : memref<27x8x8xf32, #tpu.memory_space<vmem>>, vector<1x8x8xf32>
    %53 = vector.shape_cast %52 : vector<1x8x8xf32> to vector<8x8xf32>
    %c0_46 = arith.constant 0 : index
    %c64 = arith.constant 64 : index
    %54 = vector.load %arg8[%c0_46, %c64] : memref<8x768xf32, #tpu.memory_space<vmem>>, vector<8x512xf32>
    %cst_47 = arith.constant dense<0.000000e+00> : vector<8x512xf32>
    %55 = tpu.matmul %53, %54, %cst_47 {dimension_numbers = #tpu.dot_dimension_numbers<[1], [0], [0], [1], [0, 0, 1, 1], [], []>} : vector<8x8xf32>, vector<8x512xf32>, vector<8x512xf32> -> vector<8x512xf32>
    %56 = arith.addf %51, %55 : vector<8x512xf32>
    %c5 = arith.constant 5 : index
    %c0_48 = arith.constant 0 : index
    %c0_49 = arith.constant 0 : index
    %57 = vector.load %arg4[%c5, %c0_48, %c0_49] : memref<27x8x8xf32, #tpu.memory_space<vmem>>, vector<1x8x8xf32>
    %58 = vector.shape_cast %57 : vector<1x8x8xf32> to vector<8x8xf32>
    %c0_50 = arith.constant 0 : index
    %c65 = arith.constant 65 : index
    %59 = vector.load %arg8[%c0_50, %c65] : memref<8x768xf32, #tpu.memory_space<vmem>>, vector<8x512xf32>
    %c5_51 = arith.constant 5 : index
    %c0_52 = arith.constant 0 : index
    %c0_53 = arith.constant 0 : index
    %60 = vector.load %arg6[%c5_51, %c0_52, %c0_53] : memref<9x1x512xf32, #tpu.memory_space<vmem>>, vector<1x1x512xf32>
    %61 = vector.shape_cast %60 : vector<1x1x512xf32> to vector<1x512xf32>
    %62 = vector.broadcast %61 : vector<1x512xf32> to vector<8x512xf32>
    %63 = arith.mulf %59, %62 : vector<8x512xf32>
    %cst_54 = arith.constant dense<0.000000e+00> : vector<8x512xf32>
    %64 = tpu.matmul %58, %63, %cst_54 {dimension_numbers = #tpu.dot_dimension_numbers<[1], [0], [0], [1], [0, 0, 1, 1], [], []>} : vector<8x8xf32>, vector<8x512xf32>, vector<8x512xf32> -> vector<8x512xf32>
    %65 = arith.addf %56, %64 : vector<8x512xf32>
    %c6 = arith.constant 6 : index
    %c0_55 = arith.constant 0 : index
    %c0_56 = arith.constant 0 : index
    %66 = vector.load %arg4[%c6, %c0_55, %c0_56] : memref<27x8x8xf32, #tpu.memory_space<vmem>>, vector<1x8x8xf32>
    %67 = vector.shape_cast %66 : vector<1x8x8xf32> to vector<8x8xf32>
    %c0_57 = arith.constant 0 : index
    %c71 = arith.constant 71 : index
    %68 = vector.load %arg8[%c0_57, %c71] : memref<8x768xf32, #tpu.memory_space<vmem>>, vector<8x512xf32>
    %c6_58 = arith.constant 6 : index
    %c0_59 = arith.constant 0 : index
    %c0_60 = arith.constant 0 : index
    %69 = vector.load %arg6[%c6_58, %c0_59, %c0_60] : memref<9x1x512xf32, #tpu.memory_space<vmem>>, vector<1x1x512xf32>
    %70 = vector.shape_cast %69 : vector<1x1x512xf32> to vector<1x512xf32>
    %71 = vector.broadcast %70 : vector<1x512xf32> to vector<8x512xf32>
    %72 = arith.mulf %68, %71 : vector<8x512xf32>
    %cst_61 = arith.constant dense<0.000000e+00> : vector<8x512xf32>
    %73 = tpu.matmul %67, %72, %cst_61 {dimension_numbers = #tpu.dot_dimension_numbers<[1], [0], [0], [1], [0, 0, 1, 1], [], []>} : vector<8x8xf32>, vector<8x512xf32>, vector<8x512xf32> -> vector<8x512xf32>
    %74 = arith.addf %65, %73 : vector<8x512xf32>
    %c7 = arith.constant 7 : index
    %c0_62 = arith.constant 0 : index
    %c0_63 = arith.constant 0 : index
    %75 = vector.load %arg4[%c7, %c0_62, %c0_63] : memref<27x8x8xf32, #tpu.memory_space<vmem>>, vector<1x8x8xf32>
    %76 = vector.shape_cast %75 : vector<1x8x8xf32> to vector<8x8xf32>
    %c0_64 = arith.constant 0 : index
    %c72 = arith.constant 72 : index
    %77 = vector.load %arg8[%c0_64, %c72] : memref<8x768xf32, #tpu.memory_space<vmem>>, vector<8x512xf32>
    %c7_65 = arith.constant 7 : index
    %c0_66 = arith.constant 0 : index
    %c0_67 = arith.constant 0 : index
    %78 = vector.load %arg6[%c7_65, %c0_66, %c0_67] : memref<9x1x512xf32, #tpu.memory_space<vmem>>, vector<1x1x512xf32>
    %79 = vector.shape_cast %78 : vector<1x1x512xf32> to vector<1x512xf32>
    %80 = vector.broadcast %79 : vector<1x512xf32> to vector<8x512xf32>
    %81 = arith.mulf %77, %80 : vector<8x512xf32>
    %cst_68 = arith.constant dense<0.000000e+00> : vector<8x512xf32>
    %82 = tpu.matmul %76, %81, %cst_68 {dimension_numbers = #tpu.dot_dimension_numbers<[1], [0], [0], [1], [0, 0, 1, 1], [], []>} : vector<8x8xf32>, vector<8x512xf32>, vector<8x512xf32> -> vector<8x512xf32>
    %83 = arith.addf %74, %82 : vector<8x512xf32>
    %c8 = arith.constant 8 : index
    %c0_69 = arith.constant 0 : index
    %c0_70 = arith.constant 0 : index
    %84 = vector.load %arg4[%c8, %c0_69, %c0_70] : memref<27x8x8xf32, #tpu.memory_space<vmem>>, vector<1x8x8xf32>
    %85 = vector.shape_cast %84 : vector<1x8x8xf32> to vector<8x8xf32>
    %c0_71 = arith.constant 0 : index
    %c73 = arith.constant 73 : index
    %86 = vector.load %arg8[%c0_71, %c73] : memref<8x768xf32, #tpu.memory_space<vmem>>, vector<8x512xf32>
    %c8_72 = arith.constant 8 : index
    %c0_73 = arith.constant 0 : index
    %c0_74 = arith.constant 0 : index
    %87 = vector.load %arg6[%c8_72, %c0_73, %c0_74] : memref<9x1x512xf32, #tpu.memory_space<vmem>>, vector<1x1x512xf32>
    %88 = vector.shape_cast %87 : vector<1x1x512xf32> to vector<1x512xf32>
    %89 = vector.broadcast %88 : vector<1x512xf32> to vector<8x512xf32>
    %90 = arith.mulf %86, %89 : vector<8x512xf32>
    %cst_75 = arith.constant dense<0.000000e+00> : vector<8x512xf32>
    %91 = tpu.matmul %85, %90, %cst_75 {dimension_numbers = #tpu.dot_dimension_numbers<[1], [0], [0], [1], [0, 0, 1, 1], [], []>} : vector<8x8xf32>, vector<8x512xf32>, vector<8x512xf32> -> vector<8x512xf32>
    %92 = arith.addf %83, %91 : vector<8x512xf32>
    %c9 = arith.constant 9 : index
    %c0_76 = arith.constant 0 : index
    %c0_77 = arith.constant 0 : index
    %93 = vector.load %arg4[%c9, %c0_76, %c0_77] : memref<27x8x8xf32, #tpu.memory_space<vmem>>, vector<1x8x8xf32>
    %94 = vector.shape_cast %93 : vector<1x8x8xf32> to vector<8x8xf32>
    %c0_78 = arith.constant 0 : index
    %c119 = arith.constant 119 : index
    %95 = vector.load %arg8[%c0_78, %c119] : memref<8x768xf32, #tpu.memory_space<vmem>>, vector<8x512xf32>
    %c0_79 = arith.constant 0 : index
    %c0_80 = arith.constant 0 : index
    %c0_81 = arith.constant 0 : index
    %96 = vector.load %arg6[%c0_79, %c0_80, %c0_81] : memref<9x1x512xf32, #tpu.memory_space<vmem>>, vector<1x1x512xf32>
    %97 = vector.shape_cast %96 : vector<1x1x512xf32> to vector<1x512xf32>
    %98 = vector.broadcast %97 : vector<1x512xf32> to vector<8x512xf32>
    %99 = arith.mulf %95, %98 : vector<8x512xf32>
    %cst_82 = arith.constant dense<0.000000e+00> : vector<8x512xf32>
    %100 = tpu.matmul %94, %99, %cst_82 {dimension_numbers = #tpu.dot_dimension_numbers<[1], [0], [0], [1], [0, 0, 1, 1], [], []>} : vector<8x8xf32>, vector<8x512xf32>, vector<8x512xf32> -> vector<8x512xf32>
    %101 = arith.addf %92, %100 : vector<8x512xf32>
    %c10 = arith.constant 10 : index
    %c0_83 = arith.constant 0 : index
    %c0_84 = arith.constant 0 : index
    %102 = vector.load %arg4[%c10, %c0_83, %c0_84] : memref<27x8x8xf32, #tpu.memory_space<vmem>>, vector<1x8x8xf32>
    %103 = vector.shape_cast %102 : vector<1x8x8xf32> to vector<8x8xf32>
    %c0_85 = arith.constant 0 : index
    %c120 = arith.constant 120 : index
    %104 = vector.load %arg8[%c0_85, %c120] : memref<8x768xf32, #tpu.memory_space<vmem>>, vector<8x512xf32>
    %c1_86 = arith.constant 1 : index
    %c0_87 = arith.constant 0 : index
    %c0_88 = arith.constant 0 : index
    %105 = vector.load %arg6[%c1_86, %c0_87, %c0_88] : memref<9x1x512xf32, #tpu.memory_space<vmem>>, vector<1x1x512xf32>
    %106 = vector.shape_cast %105 : vector<1x1x512xf32> to vector<1x512xf32>
    %107 = vector.broadcast %106 : vector<1x512xf32> to vector<8x512xf32>
    %108 = arith.mulf %104, %107 : vector<8x512xf32>
    %cst_89 = arith.constant dense<0.000000e+00> : vector<8x512xf32>
    %109 = tpu.matmul %103, %108, %cst_89 {dimension_numbers = #tpu.dot_dimension_numbers<[1], [0], [0], [1], [0, 0, 1, 1], [], []>} : vector<8x8xf32>, vector<8x512xf32>, vector<8x512xf32> -> vector<8x512xf32>
    %110 = arith.addf %101, %109 : vector<8x512xf32>
    %c11 = arith.constant 11 : index
    %c0_90 = arith.constant 0 : index
    %c0_91 = arith.constant 0 : index
    %111 = vector.load %arg4[%c11, %c0_90, %c0_91] : memref<27x8x8xf32, #tpu.memory_space<vmem>>, vector<1x8x8xf32>
    %112 = vector.shape_cast %111 : vector<1x8x8xf32> to vector<8x8xf32>
    %c0_92 = arith.constant 0 : index
    %c121 = arith.constant 121 : index
    %113 = vector.load %arg8[%c0_92, %c121] : memref<8x768xf32, #tpu.memory_space<vmem>>, vector<8x512xf32>
    %c2_93 = arith.constant 2 : index
    %c0_94 = arith.constant 0 : index
    %c0_95 = arith.constant 0 : index
    %114 = vector.load %arg6[%c2_93, %c0_94, %c0_95] : memref<9x1x512xf32, #tpu.memory_space<vmem>>, vector<1x1x512xf32>
    %115 = vector.shape_cast %114 : vector<1x1x512xf32> to vector<1x512xf32>
    %116 = vector.broadcast %115 : vector<1x512xf32> to vector<8x512xf32>
    %117 = arith.mulf %113, %116 : vector<8x512xf32>
    %cst_96 = arith.constant dense<0.000000e+00> : vector<8x512xf32>
    %118 = tpu.matmul %112, %117, %cst_96 {dimension_numbers = #tpu.dot_dimension_numbers<[1], [0], [0], [1], [0, 0, 1, 1], [], []>} : vector<8x8xf32>, vector<8x512xf32>, vector<8x512xf32> -> vector<8x512xf32>
    %119 = arith.addf %110, %118 : vector<8x512xf32>
    %c12 = arith.constant 12 : index
    %c0_97 = arith.constant 0 : index
    %c0_98 = arith.constant 0 : index
    %120 = vector.load %arg4[%c12, %c0_97, %c0_98] : memref<27x8x8xf32, #tpu.memory_space<vmem>>, vector<1x8x8xf32>
    %121 = vector.shape_cast %120 : vector<1x8x8xf32> to vector<8x8xf32>
    %c0_99 = arith.constant 0 : index
    %c127 = arith.constant 127 : index
    %122 = vector.load %arg8[%c0_99, %c127] : memref<8x768xf32, #tpu.memory_space<vmem>>, vector<8x512xf32>
    %c3_100 = arith.constant 3 : index
    %c0_101 = arith.constant 0 : index
    %c0_102 = arith.constant 0 : index
    %123 = vector.load %arg6[%c3_100, %c0_101, %c0_102] : memref<9x1x512xf32, #tpu.memory_space<vmem>>, vector<1x1x512xf32>
    %124 = vector.shape_cast %123 : vector<1x1x512xf32> to vector<1x512xf32>
    %125 = vector.broadcast %124 : vector<1x512xf32> to vector<8x512xf32>
    %126 = arith.mulf %122, %125 : vector<8x512xf32>
    %cst_103 = arith.constant dense<0.000000e+00> : vector<8x512xf32>
    %127 = tpu.matmul %121, %126, %cst_103 {dimension_numbers = #tpu.dot_dimension_numbers<[1], [0], [0], [1], [0, 0, 1, 1], [], []>} : vector<8x8xf32>, vector<8x512xf32>, vector<8x512xf32> -> vector<8x512xf32>
    %128 = arith.addf %119, %127 : vector<8x512xf32>
    %c14 = arith.constant 14 : index
    %c0_104 = arith.constant 0 : index
    %c0_105 = arith.constant 0 : index
    %129 = vector.load %arg4[%c14, %c0_104, %c0_105] : memref<27x8x8xf32, #tpu.memory_space<vmem>>, vector<1x8x8xf32>
    %130 = vector.shape_cast %129 : vector<1x8x8xf32> to vector<8x8xf32>
    %c0_106 = arith.constant 0 : index
    %c129 = arith.constant 129 : index
    %131 = vector.load %arg8[%c0_106, %c129] : memref<8x768xf32, #tpu.memory_space<vmem>>, vector<8x512xf32>
    %c5_107 = arith.constant 5 : index
    %c0_108 = arith.constant 0 : index
    %c0_109 = arith.constant 0 : index
    %132 = vector.load %arg6[%c5_107, %c0_108, %c0_109] : memref<9x1x512xf32, #tpu.memory_space<vmem>>, vector<1x1x512xf32>
    %133 = vector.shape_cast %132 : vector<1x1x512xf32> to vector<1x512xf32>
    %134 = vector.broadcast %133 : vector<1x512xf32> to vector<8x512xf32>
    %135 = arith.mulf %131, %134 : vector<8x512xf32>
    %cst_110 = arith.constant dense<0.000000e+00> : vector<8x512xf32>
    %136 = tpu.matmul %130, %135, %cst_110 {dimension_numbers = #tpu.dot_dimension_numbers<[1], [0], [0], [1], [0, 0, 1, 1], [], []>} : vector<8x8xf32>, vector<8x512xf32>, vector<8x512xf32> -> vector<8x512xf32>
    %137 = arith.addf %128, %136 : vector<8x512xf32>
    %c15 = arith.constant 15 : index
    %c0_111 = arith.constant 0 : index
    %c0_112 = arith.constant 0 : index
    %138 = vector.load %arg4[%c15, %c0_111, %c0_112] : memref<27x8x8xf32, #tpu.memory_space<vmem>>, vector<1x8x8xf32>
    %139 = vector.shape_cast %138 : vector<1x8x8xf32> to vector<8x8xf32>
    %c0_113 = arith.constant 0 : index
    %c135 = arith.constant 135 : index
    %140 = vector.load %arg8[%c0_113, %c135] : memref<8x768xf32, #tpu.memory_space<vmem>>, vector<8x512xf32>
    %c6_114 = arith.constant 6 : index
    %c0_115 = arith.constant 0 : index
    %c0_116 = arith.constant 0 : index
    %141 = vector.load %arg6[%c6_114, %c0_115, %c0_116] : memref<9x1x512xf32, #tpu.memory_space<vmem>>, vector<1x1x512xf32>
    %142 = vector.shape_cast %141 : vector<1x1x512xf32> to vector<1x512xf32>
    %143 = vector.broadcast %142 : vector<1x512xf32> to vector<8x512xf32>
    %144 = arith.mulf %140, %143 : vector<8x512xf32>
    %cst_117 = arith.constant dense<0.000000e+00> : vector<8x512xf32>
    %145 = tpu.matmul %139, %144, %cst_117 {dimension_numbers = #tpu.dot_dimension_numbers<[1], [0], [0], [1], [0, 0, 1, 1], [], []>} : vector<8x8xf32>, vector<8x512xf32>, vector<8x512xf32> -> vector<8x512xf32>
    %146 = arith.addf %137, %145 : vector<8x512xf32>
    %c16 = arith.constant 16 : index
    %c0_118 = arith.constant 0 : index
    %c0_119 = arith.constant 0 : index
    %147 = vector.load %arg4[%c16, %c0_118, %c0_119] : memref<27x8x8xf32, #tpu.memory_space<vmem>>, vector<1x8x8xf32>
    %148 = vector.shape_cast %147 : vector<1x8x8xf32> to vector<8x8xf32>
    %c0_120 = arith.constant 0 : index
    %c136 = arith.constant 136 : index
    %149 = vector.load %arg8[%c0_120, %c136] : memref<8x768xf32, #tpu.memory_space<vmem>>, vector<8x512xf32>
    %c7_121 = arith.constant 7 : index
    %c0_122 = arith.constant 0 : index
    %c0_123 = arith.constant 0 : index
    %150 = vector.load %arg6[%c7_121, %c0_122, %c0_123] : memref<9x1x512xf32, #tpu.memory_space<vmem>>, vector<1x1x512xf32>
    %151 = vector.shape_cast %150 : vector<1x1x512xf32> to vector<1x512xf32>
    %152 = vector.broadcast %151 : vector<1x512xf32> to vector<8x512xf32>
    %153 = arith.mulf %149, %152 : vector<8x512xf32>
    %cst_124 = arith.constant dense<0.000000e+00> : vector<8x512xf32>
    %154 = tpu.matmul %148, %153, %cst_124 {dimension_numbers = #tpu.dot_dimension_numbers<[1], [0], [0], [1], [0, 0, 1, 1], [], []>} : vector<8x8xf32>, vector<8x512xf32>, vector<8x512xf32> -> vector<8x512xf32>
    %155 = arith.addf %146, %154 : vector<8x512xf32>
    %c17 = arith.constant 17 : index
    %c0_125 = arith.constant 0 : index
    %c0_126 = arith.constant 0 : index
    %156 = vector.load %arg4[%c17, %c0_125, %c0_126] : memref<27x8x8xf32, #tpu.memory_space<vmem>>, vector<1x8x8xf32>
    %157 = vector.shape_cast %156 : vector<1x8x8xf32> to vector<8x8xf32>
    %c0_127 = arith.constant 0 : index
    %c137 = arith.constant 137 : index
    %158 = vector.load %arg8[%c0_127, %c137] : memref<8x768xf32, #tpu.memory_space<vmem>>, vector<8x512xf32>
    %c8_128 = arith.constant 8 : index
    %c0_129 = arith.constant 0 : index
    %c0_130 = arith.constant 0 : index
    %159 = vector.load %arg6[%c8_128, %c0_129, %c0_130] : memref<9x1x512xf32, #tpu.memory_space<vmem>>, vector<1x1x512xf32>
    %160 = vector.shape_cast %159 : vector<1x1x512xf32> to vector<1x512xf32>
    %161 = vector.broadcast %160 : vector<1x512xf32> to vector<8x512xf32>
    %162 = arith.mulf %158, %161 : vector<8x512xf32>
    %cst_131 = arith.constant dense<0.000000e+00> : vector<8x512xf32>
    %163 = tpu.matmul %157, %162, %cst_131 {dimension_numbers = #tpu.dot_dimension_numbers<[1], [0], [0], [1], [0, 0, 1, 1], [], []>} : vector<8x8xf32>, vector<8x512xf32>, vector<8x512xf32> -> vector<8x512xf32>
    %164 = arith.addf %155, %163 : vector<8x512xf32>
    %c18 = arith.constant 18 : index
    %c0_132 = arith.constant 0 : index
    %c0_133 = arith.constant 0 : index
    %165 = vector.load %arg4[%c18, %c0_132, %c0_133] : memref<27x8x8xf32, #tpu.memory_space<vmem>>, vector<1x8x8xf32>
    %166 = vector.shape_cast %165 : vector<1x8x8xf32> to vector<8x8xf32>
    %c0_134 = arith.constant 0 : index
    %c183 = arith.constant 183 : index
    %167 = vector.load %arg8[%c0_134, %c183] : memref<8x768xf32, #tpu.memory_space<vmem>>, vector<8x512xf32>
    %c0_135 = arith.constant 0 : index
    %c0_136 = arith.constant 0 : index
    %c0_137 = arith.constant 0 : index
    %168 = vector.load %arg6[%c0_135, %c0_136, %c0_137] : memref<9x1x512xf32, #tpu.memory_space<vmem>>, vector<1x1x512xf32>
    %169 = vector.shape_cast %168 : vector<1x1x512xf32> to vector<1x512xf32>
    %170 = vector.broadcast %169 : vector<1x512xf32> to vector<8x512xf32>
    %171 = arith.mulf %167, %170 : vector<8x512xf32>
    %cst_138 = arith.constant dense<0.000000e+00> : vector<8x512xf32>
    %172 = tpu.matmul %166, %171, %cst_138 {dimension_numbers = #tpu.dot_dimension_numbers<[1], [0], [0], [1], [0, 0, 1, 1], [], []>} : vector<8x8xf32>, vector<8x512xf32>, vector<8x512xf32> -> vector<8x512xf32>
    %173 = arith.addf %164, %172 : vector<8x512xf32>
    %c19 = arith.constant 19 : index
    %c0_139 = arith.constant 0 : index
    %c0_140 = arith.constant 0 : index
    %174 = vector.load %arg4[%c19, %c0_139, %c0_140] : memref<27x8x8xf32, #tpu.memory_space<vmem>>, vector<1x8x8xf32>
    %175 = vector.shape_cast %174 : vector<1x8x8xf32> to vector<8x8xf32>
    %c0_141 = arith.constant 0 : index
    %c184 = arith.constant 184 : index
    %176 = vector.load %arg8[%c0_141, %c184] : memref<8x768xf32, #tpu.memory_space<vmem>>, vector<8x512xf32>
    %c1_142 = arith.constant 1 : index
    %c0_143 = arith.constant 0 : index
    %c0_144 = arith.constant 0 : index
    %177 = vector.load %arg6[%c1_142, %c0_143, %c0_144] : memref<9x1x512xf32, #tpu.memory_space<vmem>>, vector<1x1x512xf32>
    %178 = vector.shape_cast %177 : vector<1x1x512xf32> to vector<1x512xf32>
    %179 = vector.broadcast %178 : vector<1x512xf32> to vector<8x512xf32>
    %180 = arith.mulf %176, %179 : vector<8x512xf32>
    %cst_145 = arith.constant dense<0.000000e+00> : vector<8x512xf32>
    %181 = tpu.matmul %175, %180, %cst_145 {dimension_numbers = #tpu.dot_dimension_numbers<[1], [0], [0], [1], [0, 0, 1, 1], [], []>} : vector<8x8xf32>, vector<8x512xf32>, vector<8x512xf32> -> vector<8x512xf32>
    %182 = arith.addf %173, %181 : vector<8x512xf32>
    %c20 = arith.constant 20 : index
    %c0_146 = arith.constant 0 : index
    %c0_147 = arith.constant 0 : index
    %183 = vector.load %arg4[%c20, %c0_146, %c0_147] : memref<27x8x8xf32, #tpu.memory_space<vmem>>, vector<1x8x8xf32>
    %184 = vector.shape_cast %183 : vector<1x8x8xf32> to vector<8x8xf32>
    %c0_148 = arith.constant 0 : index
    %c185 = arith.constant 185 : index
    %185 = vector.load %arg8[%c0_148, %c185] : memref<8x768xf32, #tpu.memory_space<vmem>>, vector<8x512xf32>
    %c2_149 = arith.constant 2 : index
    %c0_150 = arith.constant 0 : index
    %c0_151 = arith.constant 0 : index
    %186 = vector.load %arg6[%c2_149, %c0_150, %c0_151] : memref<9x1x512xf32, #tpu.memory_space<vmem>>, vector<1x1x512xf32>
    %187 = vector.shape_cast %186 : vector<1x1x512xf32> to vector<1x512xf32>
    %188 = vector.broadcast %187 : vector<1x512xf32> to vector<8x512xf32>
    %189 = arith.mulf %185, %188 : vector<8x512xf32>
    %cst_152 = arith.constant dense<0.000000e+00> : vector<8x512xf32>
    %190 = tpu.matmul %184, %189, %cst_152 {dimension_numbers = #tpu.dot_dimension_numbers<[1], [0], [0], [1], [0, 0, 1, 1], [], []>} : vector<8x8xf32>, vector<8x512xf32>, vector<8x512xf32> -> vector<8x512xf32>
    %191 = arith.addf %182, %190 : vector<8x512xf32>
    %c21 = arith.constant 21 : index
    %c0_153 = arith.constant 0 : index
    %c0_154 = arith.constant 0 : index
    %192 = vector.load %arg4[%c21, %c0_153, %c0_154] : memref<27x8x8xf32, #tpu.memory_space<vmem>>, vector<1x8x8xf32>
    %193 = vector.shape_cast %192 : vector<1x8x8xf32> to vector<8x8xf32>
    %c0_155 = arith.constant 0 : index
    %c191 = arith.constant 191 : index
    %194 = vector.load %arg8[%c0_155, %c191] : memref<8x768xf32, #tpu.memory_space<vmem>>, vector<8x512xf32>
    %c3_156 = arith.constant 3 : index
    %c0_157 = arith.constant 0 : index
    %c0_158 = arith.constant 0 : index
    %195 = vector.load %arg6[%c3_156, %c0_157, %c0_158] : memref<9x1x512xf32, #tpu.memory_space<vmem>>, vector<1x1x512xf32>
    %196 = vector.shape_cast %195 : vector<1x1x512xf32> to vector<1x512xf32>
    %197 = vector.broadcast %196 : vector<1x512xf32> to vector<8x512xf32>
    %198 = arith.mulf %194, %197 : vector<8x512xf32>
    %cst_159 = arith.constant dense<0.000000e+00> : vector<8x512xf32>
    %199 = tpu.matmul %193, %198, %cst_159 {dimension_numbers = #tpu.dot_dimension_numbers<[1], [0], [0], [1], [0, 0, 1, 1], [], []>} : vector<8x8xf32>, vector<8x512xf32>, vector<8x512xf32> -> vector<8x512xf32>
    %200 = arith.addf %191, %199 : vector<8x512xf32>
    %c22 = arith.constant 22 : index
    %c0_160 = arith.constant 0 : index
    %c0_161 = arith.constant 0 : index
    %201 = vector.load %arg4[%c22, %c0_160, %c0_161] : memref<27x8x8xf32, #tpu.memory_space<vmem>>, vector<1x8x8xf32>
    %202 = vector.shape_cast %201 : vector<1x8x8xf32> to vector<8x8xf32>
    %c0_162 = arith.constant 0 : index
    %c192 = arith.constant 192 : index
    %203 = vector.load %arg8[%c0_162, %c192] : memref<8x768xf32, #tpu.memory_space<vmem>>, vector<8x512xf32>
    %cst_163 = arith.constant dense<0.000000e+00> : vector<8x512xf32>
    %204 = tpu.matmul %202, %203, %cst_163 {dimension_numbers = #tpu.dot_dimension_numbers<[1], [0], [0], [1], [0, 0, 1, 1], [], []>} : vector<8x8xf32>, vector<8x512xf32>, vector<8x512xf32> -> vector<8x512xf32>
    %205 = arith.addf %200, %204 : vector<8x512xf32>
    %c23 = arith.constant 23 : index
    %c0_164 = arith.constant 0 : index
    %c0_165 = arith.constant 0 : index
    %206 = vector.load %arg4[%c23, %c0_164, %c0_165] : memref<27x8x8xf32, #tpu.memory_space<vmem>>, vector<1x8x8xf32>
    %207 = vector.shape_cast %206 : vector<1x8x8xf32> to vector<8x8xf32>
    %c0_166 = arith.constant 0 : index
    %c193 = arith.constant 193 : index
    %208 = vector.load %arg8[%c0_166, %c193] : memref<8x768xf32, #tpu.memory_space<vmem>>, vector<8x512xf32>
    %c5_167 = arith.constant 5 : index
    %c0_168 = arith.constant 0 : index
    %c0_169 = arith.constant 0 : index
    %209 = vector.load %arg6[%c5_167, %c0_168, %c0_169] : memref<9x1x512xf32, #tpu.memory_space<vmem>>, vector<1x1x512xf32>
    %210 = vector.shape_cast %209 : vector<1x1x512xf32> to vector<1x512xf32>
    %211 = vector.broadcast %210 : vector<1x512xf32> to vector<8x512xf32>
    %212 = arith.mulf %208, %211 : vector<8x512xf32>
    %cst_170 = arith.constant dense<0.000000e+00> : vector<8x512xf32>
    %213 = tpu.matmul %207, %212, %cst_170 {dimension_numbers = #tpu.dot_dimension_numbers<[1], [0], [0], [1], [0, 0, 1, 1], [], []>} : vector<8x8xf32>, vector<8x512xf32>, vector<8x512xf32> -> vector<8x512xf32>
    %214 = arith.addf %205, %213 : vector<8x512xf32>
    %c24 = arith.constant 24 : index
    %c0_171 = arith.constant 0 : index
    %c0_172 = arith.constant 0 : index
    %215 = vector.load %arg4[%c24, %c0_171, %c0_172] : memref<27x8x8xf32, #tpu.memory_space<vmem>>, vector<1x8x8xf32>
    %216 = vector.shape_cast %215 : vector<1x8x8xf32> to vector<8x8xf32>
    %c0_173 = arith.constant 0 : index
    %c199 = arith.constant 199 : index
    %217 = vector.load %arg8[%c0_173, %c199] : memref<8x768xf32, #tpu.memory_space<vmem>>, vector<8x512xf32>
    %c6_174 = arith.constant 6 : index
    %c0_175 = arith.constant 0 : index
    %c0_176 = arith.constant 0 : index
    %218 = vector.load %arg6[%c6_174, %c0_175, %c0_176] : memref<9x1x512xf32, #tpu.memory_space<vmem>>, vector<1x1x512xf32>
    %219 = vector.shape_cast %218 : vector<1x1x512xf32> to vector<1x512xf32>
    %220 = vector.broadcast %219 : vector<1x512xf32> to vector<8x512xf32>
    %221 = arith.mulf %217, %220 : vector<8x512xf32>
    %cst_177 = arith.constant dense<0.000000e+00> : vector<8x512xf32>
    %222 = tpu.matmul %216, %221, %cst_177 {dimension_numbers = #tpu.dot_dimension_numbers<[1], [0], [0], [1], [0, 0, 1, 1], [], []>} : vector<8x8xf32>, vector<8x512xf32>, vector<8x512xf32> -> vector<8x512xf32>
    %223 = arith.addf %214, %222 : vector<8x512xf32>
    %c25 = arith.constant 25 : index
    %c0_178 = arith.constant 0 : index
    %c0_179 = arith.constant 0 : index
    %224 = vector.load %arg4[%c25, %c0_178, %c0_179] : memref<27x8x8xf32, #tpu.memory_space<vmem>>, vector<1x8x8xf32>
    %225 = vector.shape_cast %224 : vector<1x8x8xf32> to vector<8x8xf32>
    %c0_180 = arith.constant 0 : index
    %c200 = arith.constant 200 : index
    %226 = vector.load %arg8[%c0_180, %c200] : memref<8x768xf32, #tpu.memory_space<vmem>>, vector<8x512xf32>
    %c7_181 = arith.constant 7 : index
    %c0_182 = arith.constant 0 : index
    %c0_183 = arith.constant 0 : index
    %227 = vector.load %arg6[%c7_181, %c0_182, %c0_183] : memref<9x1x512xf32, #tpu.memory_space<vmem>>, vector<1x1x512xf32>
    %228 = vector.shape_cast %227 : vector<1x1x512xf32> to vector<1x512xf32>
    %229 = vector.broadcast %228 : vector<1x512xf32> to vector<8x512xf32>
    %230 = arith.mulf %226, %229 : vector<8x512xf32>
    %cst_184 = arith.constant dense<0.000000e+00> : vector<8x512xf32>
    %231 = tpu.matmul %225, %230, %cst_184 {dimension_numbers = #tpu.dot_dimension_numbers<[1], [0], [0], [1], [0, 0, 1, 1], [], []>} : vector<8x8xf32>, vector<8x512xf32>, vector<8x512xf32> -> vector<8x512xf32>
    %232 = arith.addf %223, %231 : vector<8x512xf32>
    %c26 = arith.constant 26 : index
    %c0_185 = arith.constant 0 : index
    %c0_186 = arith.constant 0 : index
    %233 = vector.load %arg4[%c26, %c0_185, %c0_186] : memref<27x8x8xf32, #tpu.memory_space<vmem>>, vector<1x8x8xf32>
    %234 = vector.shape_cast %233 : vector<1x8x8xf32> to vector<8x8xf32>
    %c0_187 = arith.constant 0 : index
    %c201 = arith.constant 201 : index
    %235 = vector.load %arg8[%c0_187, %c201] : memref<8x768xf32, #tpu.memory_space<vmem>>, vector<8x512xf32>
    %c8_188 = arith.constant 8 : index
    %c0_189 = arith.constant 0 : index
    %c0_190 = arith.constant 0 : index
    %236 = vector.load %arg6[%c8_188, %c0_189, %c0_190] : memref<9x1x512xf32, #tpu.memory_space<vmem>>, vector<1x1x512xf32>
    %237 = vector.shape_cast %236 : vector<1x1x512xf32> to vector<1x512xf32>
    %238 = vector.broadcast %237 : vector<1x512xf32> to vector<8x512xf32>
    %239 = arith.mulf %235, %238 : vector<8x512xf32>
    %cst_191 = arith.constant dense<0.000000e+00> : vector<8x512xf32>
    %240 = tpu.matmul %234, %239, %cst_191 {dimension_numbers = #tpu.dot_dimension_numbers<[1], [0], [0], [1], [0, 0, 1, 1], [], []>} : vector<8x8xf32>, vector<8x512xf32>, vector<8x512xf32> -> vector<8x512xf32>
    %241 = arith.addf %232, %240 : vector<8x512xf32>
    %c0_192 = arith.constant 0 : index
    %c0_193 = arith.constant 0 : index
    %242 = vector.load %arg5[%c0_192, %c0_193] : memref<8x1xf32, #tpu.memory_space<vmem>>, vector<8x1xf32>
    %243 = vector.broadcast %242 : vector<8x1xf32> to vector<8x512xf32>
    %244 = arith.addf %241, %243 : vector<8x512xf32>
    %c0_194 = arith.constant 0 : index
    %c0_195 = arith.constant 0 : index
    %c0_196 = arith.constant 0 : index
    %245 = vector.load %arg7[%c0_194, %c0_195, %c0_196] : memref<1x8x512xf32, #tpu.memory_space<vmem>>, vector<1x8x512xf32>
    %246 = vector.shape_cast %245 : vector<1x8x512xf32> to vector<8x512xf32>
    %247 = vector.shape_cast %244 : vector<8x512xf32> to vector<1x8x512xf32>
    tpu.vector_store %arg7[%c0_194, %c0_195, %c0_196], %247 {strides = array<i32>} : memref<1x8x512xf32, #tpu.memory_space<vmem>>, vector<1x8x512xf32>,
    return
  }
  func.func @transform_0(%arg0: i32) -> (i32, i32, i32) {
    %c0_i32 = arith.constant 0 : i32
    %c0_i32_0 = arith.constant 0 : i32
    %c0_i32_1 = arith.constant 0 : i32
    return %arg0, %c0_i32, %c0_i32_0 : i32, i32, i32
  }
  func.func @transform_1(%arg0: i32) -> (i32, i32) {
    %c0_i32 = arith.constant 0 : i32
    %c0_i32_0 = arith.constant 0 : i32
    %c0_i32_1 = arith.constant 0 : i32
    return %c0_i32, %c0_i32_0 : i32, i32
  }
  func.func @transform_2(%arg0: i32) -> (i32, i32) {
    %c0_i32 = arith.constant 0 : i32
    %c0_i32_0 = arith.constant 0 : i32
    %c0_i32_1 = arith.constant 0 : i32
    return %c0_i32, %c0_i32_0 : i32, i32
  }
  func.func @transform_3(%arg0: i32) -> (i32, i32, i32) {
    %c0_i32 = arith.constant 0 : i32
    %c0_i32_0 = arith.constant 0 : i32
    %c0_i32_1 = arith.constant 0 : i32
    %c0_i32_2 = arith.constant 0 : i32
    return %c0_i32, %c0_i32_0, %c0_i32_1 : i32, i32, i32
  }
  func.func @transform_4(%arg0: i32) -> (i32, i32) {
    %c0_i32 = arith.constant 0 : i32
    %c0_i32_0 = arith.constant 0 : i32
    %c0_i32_1 = arith.constant 0 : i32
    return %c0_i32, %c0_i32_0 : i32, i32
  }
  func.func @transform_5(%arg0: i32) -> (i32, i32, i32) {
    %c0_i32 = arith.constant 0 : i32
    %c0_i32_0 = arith.constant 0 : i32
    %c0_i32_1 = arith.constant 0 : i32
    %c0_i32_2 = arith.constant 0 : i32
    return %c0_i32, %c0_i32_0, %c0_i32_1 : i32, i32, i32
  }
  func.func @transform_6(%arg0: i32) -> (i32, i32, i32) {
    %c0_i32 = arith.constant 0 : i32
    %c0_i32_0 = arith.constant 0 : i32
    %c0_i32_1 = arith.constant 0 : i32
    return %arg0, %c0_i32, %c0_i32_0 : i32, i32, i32
  }
}

</mosaic_0001>

<bundles_post_ra>
// kernel: basic_unet_forward.1
= control target key start
LH: loop header
LB: loop body
LE: loop exit
PB: predicated region body
PF: predicated region fallthrough
CT: control target
= control target key end

     0   :  { %s6022_s21 = smov 0   ;;  %s7372_s0 = inlined_call_operand.vmem [shape: f32[2,4,512], index: 0, kind: input, shape index: {}]   ;;  %s7373_s1 = inlined_call_operand.vmem [shape: f32[8,4], index: 1, kind: input, shape index: {}]   ;;  %s7374_s2 = inlined_call_operand.vmem [shape: f32[8,1], index: 2, kind: input, shape index: {}]   ;;  %s7375_s3 = inlined_call_operand.vmem [shape: f32[27,8,8], index: 3, kind: input, shape index: {}]   ;;  %s7376_s4 = inlined_call_operand.vmem [shape: f32[8,1], index: 4, kind: input, shape index: {}]   ;;  %s7377_s5 = inlined_call_operand.vmem [shape: f32[9,1,512], index: 5, kind: input, shape index: {}]   ;;  %s7378_s6 = inlined_call_operand.vmem [shape: f32[2,8,512], index: 6, kind: output, shape index: {}]  }
   0x1 LB: > { %s5719_s22 = sadd.s32 4294967295, %s5966_s21   ;;  %p5723_p0 = scmp.ge.s32.totalorder %s5966_s21, 1  ;;  %s5966_s21 = sphi %s6022_s21, %s16_s21  }
   0x2   : > { %p212_p1 = scmp.lt.s32.totalorder %s5966_s21, 3 }
   0x4   : > { %p213_p2 = pnand %p5723_p0, %p212_p1 }
   0x6   : > { %216 = sbr.rel (%p213_p2) target bundleno = 848 (0x350), region = 44 }
   0xd   : > { %v255_v0 = vld [vmem:[%s7374_s2] sm:$0xff]  ;;  %v440_v1 = vlaneseq  ;;  %p242_p3 = scmp.lt.s32.totalorder %s5719_s22, 1  ;;  %v5968_v2 = vmov 0   ;;  %v7379_v4 = vmov 0.0   ;;  %vm269_vm0 = vcmask 1043456   ;;  %s5970_s7 = smov 55  }
   0xe   : > { %5956 = vset.pattern.permute.xlu0 %v5968_v2  ;;  %5957 = vset.pattern.permute.xlu1 %v5968_v2  ;;  %v438_v5 = vld [vmem:[%s7377_s5] sm:$0xf]  ;;  %vm265_vm1 = vcmask 31744   ;;  %v5740_v19 = vld [vmem:[%s7377_s5 + $0x4] sm:$0xf]  ;;  %s5971_s12 = smov 56  }
   0xf   : > { %258 = vperm.xlu0 %5956, %v255_v0   ;;  %v441_v3 = vshrl.u32 %v440_v1, 7  ;;  %s7450_s22 = smov (!%p242_p3, %s5719_s22), 1  ;;  %342 = vmatprep.mubr.f32.mxu0 %v7379_v4  ;;  %v254_v16 = vld [vmem:[%s7373_s1] sm:$0xff]  ;;  %v5744_v24 = vld [vmem:[%s7377_s5 + $0x8] sm:$0xf]  ;;  %s5972_s15 = smov 57  }
  0x10   : > { %413 = vmatprep.mubr.f32.mxu1 %v7379_v4  ;;  %s5823_s27 = sshll.u32 %s7450_s22, 4  ;;  %v5748_v29 = vld [vmem:[%s7377_s5 + $0xc] sm:$0xf]  ;;  %s5973_s18 = smov 63   ;;  %v5755_v34 = vld [vmem:[%s7377_s5 + $0x14] sm:$0xf] }
  0x11   : > { %v6040_v6 = vsub.s32 1, %v441_v3  ;;  %v6043_v7 = vsub.s32 2, %v441_v3  ;;  %v6045_v8 = vsub.s32 0, %v441_v3  ;;  %v6047_v9 = vsub.s32 3, %v441_v3  ;;  %s246_s30 = scalar_lea.vmem %s7372_s0, %s5823_s27  ;;  %s5974_s23 = smov 65  }
  0x12   : > { %v252_v11 = vld [vmem:[%s246_s30] sm:$0xff]  ;;  %v253_v12 = vld [vmem:[%s246_s30 + $0x8] sm:$0xff]  ;;  %v5759_v39 = vld [vmem:[%s7377_s5 + $0x18] sm:$0xf]  ;;  %s5975_s26 = smov 71   ;;  %s5976_s29 = smov 72  }
  0x13   : > { %v6053_v10 = vrot.slane %v438_v5, %v6040_v6  ;;  %v6056_v13 = vrot.slane %v438_v5, %v6045_v8  ;;  %v263_v14 = vcombine.high %v252_v11, %v252_v11  ;;  %v264_v15 = vcombine.high %v253_v12, %v253_v12  ;;  %v5763_v44 = vld [vmem:[%s7377_s5 + $0x1c] sm:$0xf]  ;;  %v5767_v49 = vld [vmem:[%s7377_s5 + $0x20] sm:$0xf]  ;;  %s5977_s9 = smov 73   ;;  %s5978_s10 = smov 119  }
  0x14   : > { %v6064_v17 = vrot.slane %v438_v5, %v6043_v7  ;;  %v6069_v18 = vrot.slane %v438_v5, %v6047_v9  ;;  %v6081_v20 = vrot.slane %v5740_v19, %v6045_v8  ;;  %v6086_v21 = vrot.slane %v5740_v19, %v6040_v6  ;;  %s5979_s11 = smov 120   ;;  %s5980_s13 = smov 121  }
  0x15   : > { %458 = vrot.lane.b32.xlu1 %v6053_v10, %s5970_s7  ;;  %456 = vrot.lane.b32.xlu0 %v6056_v13, %s5970_s7  ;;  %v6093_v22 = vrot.slane %v5740_v19, %v6043_v7  ;;  %v6098_v23 = vrot.slane %v5740_v19, %v6047_v9  ;;  %v6106_v25 = vrot.slane %v5744_v24, %v6045_v8  ;;  %s5981_s14 = smov 64   ;;  %s5982_s16 = smov 127   ;;  %vm464_vm2 = vcmask 449536  }
  0x16   : > { %5728 = vmatprep.subr.msk.mxu0 %vm269_vm0, %v263_v14  ;;  %5731 = vmatprep.subr.msk.mxu1 %vm269_vm0, %v264_v15  ;;  %v6111_v26 = vrot.slane %v5744_v24, %v6040_v6  ;;  %v6116_v27 = vrot.slane %v5744_v24, %v6043_v7  ;;  %v6121_v28 = vrot.slane %v5744_v24, %v6047_v9  ;;  %s5983_s17 = smov 1   ;;  %s5984_s19 = smov 7   ;;  %vm822_vm3 = vcmask 457728  }
  0x17   : > { %5729 = vmatpush1.msk.msra.mxu0 %vm269_vm0, %v252_v11  ;;  %5732 = vmatpush1.msk.msra.mxu1 %vm269_vm0, %v253_v12  ;;  %v6129_v30 = vrot.slane %v5748_v29, %v6045_v8  ;;  %v6134_v31 = vrot.slane %v5748_v29, %v6040_v6  ;;  %v6139_v32 = vrot.slane %v5748_v29, %v6043_v7  ;;  %s5985_s20 = smov 8   ;;  %vm1038_vm4 = vcmask 465920   ;;  %s5986_s24 = smov 9  }
  0x18   : > { %5730 = vmatmul.mubr.msk.f32.vlgmr.msra.gmra.mrb[0].mxu0 %vm265_vm1, %v254_v16  ;;  %5733 = vmatmul.mubr.msk.f32.vlgmr.msra.gmra.mrb[0].mxu1 %vm265_vm1, %v254_v16  ;;  %v6144_v33 = vrot.slane %v5748_v29, %v6047_v9  ;;  %v6152_v35 = vrot.slane %v5755_v34, %v6045_v8  ;;  %v1628_v36 = vrot.slane %v5755_v34, %v6040_v6  ;;  %vm1254_vm5 = vcmask 515072  }
  0x19   : > { %460 = vrot.lane.b32.xlu1 %v6064_v17, %s5970_s7  ;;  %462 = vrot.lane.b32.xlu0 %v6069_v18, %s5970_s7  ;;  %v1632_v37 = vrot.slane %v5755_v34, %v6043_v7  ;;  %v1636_v38 = vrot.slane %v5755_v34, %v6047_v9  ;;  %v1838_v40 = vrot.slane %v5759_v39, %v6045_v8  ;;  %vm1067_vm6 = vcmask 580608  }
  0x1a   : > { %570 = vmatprep.mubr.f32.mxu0 %v7379_v4  ;;  %641 = vmatprep.mubr.f32.mxu1 %v7379_v4  ;;  %v1842_v41 = vrot.slane %v5759_v39, %v6040_v6  ;;  %v1846_v42 = vrot.slane %v5759_v39, %v6043_v7  ;;  %v1850_v43 = vrot.slane %v5759_v39, %v6047_v9  ;;  %vm1283_vm7 = vcmask 531456  }
  0x1b   : > { %v6178_v45 = vrot.slane %v5763_v44, %v6040_v6  ;;  %v6182_v46 = vrot.slane %v5763_v44, %v6045_v8  ;;  %v6187_v47 = vrot.slane %v5763_v44, %v6047_v9  ;;  %v6192_v48 = vrot.slane %v5763_v44, %v6043_v7 }
  0x1c   : > { %v6200_v50 = vrot.slane %v5767_v49, %v6040_v6  ;;  %v6205_v51 = vrot.slane %v5767_v49, %v6045_v8  ;;  %v6210_v52 = vrot.slane %v5767_v49, %v6047_v9  ;;  %v6215_v53 = vrot.slane %v5767_v49, %v6043_v7 }
  0x1d   : > { %814 = vrot.lane.b32.xlu1 %v6081_v20, %s5971_s12  ;;  %816 = vrot.lane.b32.xlu0 %v6086_v21, %s5971_s12  ;;  %vm7401_vm8 = vcmask 588800   ;;  %vm493_vm9 = vcmask 596992   ;;  %vm2679_vm10 = vcmask 982016   ;;  %vm2482_vm11 = vcmask 973824  }
  0x1e   : > { %vm2875_vm12 = vcmask 990208   ;;  %vm3072_vm13 = vcmask 1039360   ;;  %vm3101_vm14 = vcmask 7168   ;;  %vm2904_vm15 = vcmask 56320  }
  0x1f   : > { %vm502_vm0 = vcmask 64512   ;;  %vm2511_vm1 = vcmask 72704  }
  0x21   : > { %818 = vrot.lane.b32.xlu1 %v6093_v22, %s5971_s12  ;;  %820 = vrot.lane.b32.xlu0 %v6098_v23, %s5971_s12 }
  0x25   : > { %1030 = vrot.lane.b32.xlu1 %v6106_v25, %s5972_s15  ;;  %1032 = vrot.lane.b32.xlu0 %v6111_v26, %s5972_s15 }
  0x29   : > { %1034 = vrot.lane.b32.xlu1 %v6116_v27, %s5972_s15  ;;  %1036 = vrot.lane.b32.xlu0 %v6121_v28, %s5972_s15 }
  0x2d   : > { %1246 = vrot.lane.b32.xlu1 %v6129_v30, %s5973_s18  ;;  %1248 = vrot.lane.b32.xlu0 %v6134_v31, %s5973_s18 }
  0x31   : > { %1250 = vrot.lane.b32.xlu1 %v6139_v32, %s5973_s18  ;;  %1252 = vrot.lane.b32.xlu0 %v6144_v33, %s5973_s18 }
  0x35   : > { %1637 = vrot.lane.b32.xlu1 %v6152_v35, %s5974_s23  ;;  %1639 = vrot.lane.b32.xlu0 %v1628_v36, %s5974_s23 }
  0x39   : > { %1641 = vrot.lane.b32.xlu1 %v1632_v37, %s5974_s23  ;;  %1643 = vrot.lane.b32.xlu0 %v1636_v38, %s5974_s23 }
  0x3d   : > { %1851 = vrot.lane.b32.xlu1 %v1838_v40, %s5975_s26  ;;  %1853 = vrot.lane.b32.xlu0 %v1842_v41, %s5975_s26 }
  0x41   : > { %1855 = vrot.lane.b32.xlu1 %v1846_v42, %s5975_s26  ;;  %1857 = vrot.lane.b32.xlu0 %v1850_v43, %s5975_s26 }
  0x45   : > { %2067 = vrot.lane.b32.xlu1 %v6178_v45, %s5976_s29  ;;  %2065 = vrot.lane.b32.xlu0 %v6182_v46, %s5976_s29 }
  0x49   : > { %2071 = vrot.lane.b32.xlu1 %v6187_v47, %s5976_s29  ;;  %2069 = vrot.lane.b32.xlu0 %v6192_v48, %s5976_s29 }
  0x4d   : > { %2281 = vrot.lane.b32.xlu1 %v6200_v50, %s5977_s9  ;;  %2279 = vrot.lane.b32.xlu0 %v6205_v51, %s5977_s9 }
  0x51   : > { %2285 = vrot.lane.b32.xlu1 %v6210_v52, %s5977_s9  ;;  %2283 = vrot.lane.b32.xlu0 %v6215_v53, %s5977_s9 }
  0x55   : > { %2474 = vrot.lane.b32.xlu1 %v6056_v13, %s5978_s10  ;;  %2476 = vrot.lane.b32.xlu0 %v6053_v10, %s5978_s10 }
  0x59   : > { %2478 = vrot.lane.b32.xlu1 %v6064_v17, %s5978_s10  ;;  %2480 = vrot.lane.b32.xlu0 %v6069_v18, %s5978_s10 }
  0x5d   : > { %2673 = vrot.lane.b32.xlu1 %v6086_v21, %s5979_s11  ;;  %2671 = vrot.lane.b32.xlu0 %v6081_v20, %s5979_s11 }
  0x61   : > { %2677 = vrot.lane.b32.xlu1 %v6098_v23, %s5979_s11  ;;  %2675 = vrot.lane.b32.xlu0 %v6093_v22, %s5979_s11 }
  0x65   : > { %2867 = vrot.lane.b32.xlu1 %v6106_v25, %s5980_s13  ;;  %2869 = vrot.lane.b32.xlu0 %v6111_v26, %s5980_s13 }
  0x69   : > { %2871 = vrot.lane.b32.xlu1 %v6116_v27, %s5980_s13  ;;  %2873 = vrot.lane.b32.xlu0 %v6121_v28, %s5980_s13 }
  0x6d   : > { %1448 = vrot.lane.b32.xlu1 %v7379_v4, %s5981_s14  ;;  %3064 = vrot.lane.b32.xlu0 %v6129_v30, %s5982_s16 }
  0x71   : > { %3066 = vrot.lane.b32.xlu1 %v6134_v31, %s5982_s16  ;;  %3068 = vrot.lane.b32.xlu0 %v6139_v32, %s5982_s16 }
  0x75   : > { %3070 = vrot.lane.b32.xlu1 %v6144_v33, %s5982_s16  ;;  %3268 = vrot.lane.b32.xlu0 %v1628_v36, %s5983_s17 }
  0x79   : > { %3266 = vrot.lane.b32.xlu1 %v6152_v35, %s5983_s17  ;;  %3272 = vrot.lane.b32.xlu0 %v1636_v38, %s5983_s17 }
  0x7d   : > { %3270 = vrot.lane.b32.xlu1 %v1632_v37, %s5983_s17  ;;  %3461 = vrot.lane.b32.xlu0 %v1838_v40, %s5984_s19 }
  0x81   : > { %3463 = vrot.lane.b32.xlu1 %v1842_v41, %s5984_s19  ;;  %3465 = vrot.lane.b32.xlu0 %v1846_v42, %s5984_s19 }
  0x85   : > { %3467 = vrot.lane.b32.xlu1 %v1850_v43, %s5984_s19 }
  0x87   : > { %v6264_v54 = vpop.permute.xlu1 %458 }
  0x8b   : > { %v6266_v55 = vpop.permute.xlu1 %460 }
  0x8e   : > { %v259_v56 = vpop.permute.xlu0 %258 }
  0x8f   : > { %v6268_v57 = vpop.permute.xlu1 %814 }
  0x90   : > { %v831_v58 = vmul.f32 0.0, %v6268_v57 }
  0x92   : > { %v6271_v59 = vpop.permute.xlu0 %456  ;;  %841 = vrot.lane.b32.xlu0 %v831_v58, %s5976_s29 }
  0x93   : > { %v6274_v60 = vpop.permute.xlu1 %818  ;;  %v473_v61 = vmul.f32 0.0, %v6271_v59  ;;  %v6353_v38 = vsel %vm464_vm2, %v6271_v59, %v6264_v54 }
  0x95   : > { %483 = vrot.lane.b32.xlu1 %v473_v61, %s5977_s9 }
  0x96   : > { %v6278_v62 = vpop.permute.xlu0 %462 }
  0x97   : > { %v6280_v63 = vpop.permute.xlu1 %1030  ;;  %v6373_v44 = vsel %vm464_vm2, %v6266_v55, %v6278_v62 }
  0x98   : > { %v1047_v0 = vmul.f32 0.0, %v6280_v63 }
  0x9a   : > { %v6283_v1 = vpop.permute.xlu0 %816  ;;  %1057 = vrot.lane.b32.xlu1 %v1047_v0, %s5975_s26 }
  0x9b   : > { %v6286_v2 = vpop.permute.xlu1 %1034  ;;  %v6358_v39 = vsel %vm822_vm3, %v6268_v57, %v6283_v1 }
  0x9e   : > { %v6288_v3 = vpop.permute.xlu0 %820 }
  0x9f   : > { %v6290_v5 = vpop.permute.xlu1 %1246  ;;  %v6380_v49 = vsel %vm822_vm3, %v6274_v60, %v6288_v3 }
  0xa0   : > { %v1263_v6 = vmul.f32 0.0, %v6290_v5 }
  0xa2   : > { %v6293_v7 = vpop.permute.xlu0 %1032  ;;  %1273 = vrot.lane.b32.xlu0 %v1263_v6, %s5974_s23 }
  0xa3   : > { %v6296_v8 = vpop.permute.xlu1 %1250  ;;  %v6390_v61 = vsel %vm1038_vm4, %v6280_v63, %v6293_v7 }
  0xa6   : > { %v6298_v9 = vpop.permute.xlu0 %1036 }
  0xa7   : > { %v6300_v10 = vpop.permute.xlu1 %1637 }
  0xa8   : > { %7402 = vst [vmem:[#allocation3_spill] sm:$0xff] %v6300_v10  ;;  %v1653_v11 = vmul.f32 0.0, %v6300_v10 }
  0xaa   : > { %v6303_v12 = vpop.permute.xlu0 %1248  ;;  %1663 = vrot.lane.b32.xlu0 %v1653_v11, %s5973_s18 }
  0xab   : > { %v6306_v13 = vpop.permute.xlu1 %1641  ;;  %v6398_v6 = vsel %vm1254_vm5, %v6290_v5, %v6303_v12 }
  0xae   : > { %v6308_v14 = vpop.permute.xlu0 %1252 }
  0xaf   : > { %v6310_v15 = vpop.permute.xlu1 %1851 }
  0xb0   : > { %7403 = vst [vmem:[#allocation4_spill] sm:$0xff] %v6310_v15  ;;  %v1867_v16 = vmul.f32 0.0, %v6310_v15 }
  0xb2   : > { %1877 = vrot.lane.b32.xlu1 %v1867_v16, %s5972_s15  ;;  %v6314_v17 = vpop.permute.xlu0 %1639 }
  0xb3   : > { %v6328_v23 = vpop.permute.xlu1 %1855 }
  0xb6   : > { %3656 = vrot.lane.b32.xlu1 %v6182_v46, %s5985_s20  ;;  %v6318_v18 = vpop.permute.xlu0 %1643 }
  0xb7   : > { %7404 = vst [vmem:[#allocation5_spill] sm:$0xff] %v6318_v18  ;;  %v6330_v24 = vpop.permute.xlu1 %2067 }
  0xba   : > { %v6320_v19 = vpop.permute.xlu0 %1853 }
  0xbb   : > { %v6336_v35 = vpop.permute.xlu1 %2071 }
  0xbc   : > { %7407 = vst [vmem:[#allocation8_spill] sm:$0xff] %v6336_v35 }
  0xbe   : > { %v6322_v20 = vpop.permute.xlu0 %1857 }
  0xbf   : > { %7405 = vst [vmem:[#allocation6_spill] sm:$0xff] %v6322_v20  ;;  %v6360_v40 = vpop.permute.xlu1 %2281 }
  0xc2   : > { %v6324_v21 = vpop.permute.xlu0 %2065 }
  0xc3   : > { %7406 = vst [vmem:[#allocation7_spill] sm:$0xff] %v6324_v21  ;;  %v2081_v22 = vmul.f32 0.0, %v6324_v21  ;;  %v6384_v58 = vpop.permute.xlu1 %2285 }
  0xc4   : > { %7408 = vst [vmem:[#allocation9_spill] sm:$0xff] %v6384_v58 }
  0xc5   : > { %2091 = vrot.lane.b32.xlu0 %v2081_v22, %s5971_s12  ;;  %v6409_v22 = vsel %vm1038_vm4, %v6286_v2, %v6298_v9 }
  0xc6   : > { %v6364_v42 = vpop.permute.xlu0 %2069 }
  0xca   : > { %v6392_v0 = vpop.permute.xlu0 %2279 }
  0xcb   : > { %7409 = vst [vmem:[#allocation10_spill] sm:$0xff] %v6392_v0 }
  0xeb   : > { %v344_v25 = vpop.f32.mrb[0].mxu0  ;;  %v415_v26 = vpop.f32.mrb[0].mxu1 }
  0xec   : > { %v345_v27 = vadd.f32 %v344_v25, %v259_v56  ;;  %v346_v28 = vpop.f32.mrb[1].mxu0  ;;  %v417_v29 = vpop.f32.mrb[1].mxu1  ;;  %v416_v32 = vadd.f32 %v415_v26, %v259_v56 }
  0xed   : > { %v347_v30 = vadd.f32 %v346_v28, %v259_v56  ;;  %v418_v34 = vadd.f32 %v417_v29, %v259_v56  ;;  %v6411_v25 = vpop.permute.xlu1 %2474  ;;  %v6420_v28 = vpop.permute.xlu0 %2283 }
  0xee   : > { %v6332_v31 = vmax.f32 %v345_v27, 0.0  ;;  %v6342_v36 = vmax.f32 %v416_v32, 0.0  ;;  %v6418_v27 = vsel %vm1254_vm5, %v6296_v8, %v6308_v14  ;;  %v6434_v32 = vsel %vm1283_vm7, %v6300_v10, %v6314_v17 }
  0xef   : > { %v6334_v33 = vmax.f32 %v347_v30, 0.0  ;;  %v6344_v37 = vmax.f32 %v418_v34, 0.0  ;;  %v6428_v30 = vsel %vm1067_vm6, %v6310_v15, %v6320_v19  ;;  %7411 = vst [vmem:[#allocation12_spill] sm:$0xff] %v6434_v32  ;;  %v6476_v15 = vsel %vm493_vm9, %v6392_v0, %v6360_v40 }
  0xf0   : > { %1450 = vrot.lane.b32.xlu1 %v6332_v31, %s5981_s14  ;;  %v474_v41 = vmul.f32 %v6353_v38, %v6332_v31  ;;  %v832_v43 = vmul.f32 %v6358_v39, %v6332_v31  ;;  %v476_v46 = vmul.f32 %v6373_v44, %v6342_v36  ;;  %v834_v56 = vmul.f32 %v6380_v49, %v6342_v36 }
  0xf1   : > { %1452 = vrot.lane.b32.xlu0 %v6334_v33, %s5981_s14  ;;  %v1048_v11 = vmul.f32 %v6390_v61, %v6332_v31  ;;  %v1264_v16 = vmul.f32 %v6398_v6, %v6332_v31  ;;  %v1050_v26 = vmul.f32 %v6409_v22, %v6342_v36  ;;  %v1266_v29 = vmul.f32 %v6418_v27, %v6342_v36 }
  0xf2   : > { %7410 = vst [vmem:[#allocation11_spill] sm:$0xff] %v6428_v30  ;;  %v1868_v34 = vmul.f32 %v6428_v30, %v6332_v31  ;;  %7415 = vst [vmem:[#allocation16_spill] sm:$0xff] %v6476_v15 }
  0xf4   : > { %1454 = vrot.lane.b32.xlu1 %v6342_v36, %s5981_s14 }
  0xf5   : > { %1456 = vrot.lane.b32.xlu0 %v6344_v37, %s5981_s14 }
  0xf8   : > { %485 = vrot.lane.b32.xlu1 %v474_v41, %s5977_s9  ;;  %v1654_v41 = vmul.f32 %v6434_v32, %v6332_v31 }
  0xf9   : > { %843 = vrot.lane.b32.xlu0 %v832_v43, %s5976_s29  ;;  %v6440_v43 = vpop.permute.xlu1 %2478 }
  0xfc   : > { %489 = vrot.lane.b32.xlu1 %v476_v46, %s5977_s9  ;;  %v6443_v46 = vpop.permute.xlu0 %2476 }
  0xfd   : > { %847 = vrot.lane.b32.xlu0 %v834_v56, %s5976_s29  ;;  %v6449_v56 = vsel %vm1067_vm6, %v6328_v23, %v6322_v20 }
  0xfe   : > { %7412 = vst [vmem:[#allocation13_spill] sm:$0xff] %v6449_v56 }
 0x100   : > { %1059 = vrot.lane.b32.xlu1 %v1048_v11, %s5975_s26  ;;  %v1870_v11 = vmul.f32 %v6449_v56, %v6342_v36 }
 0x101   : > { %1275 = vrot.lane.b32.xlu0 %v1264_v16, %s5974_s23  ;;  %v6456_v16 = vsel %vm1283_vm7, %v6306_v13, %v6318_v18 }
 0x102   : > { %7413 = vst [vmem:[#allocation14_spill] sm:$0xff] %v6456_v16 }
 0x104   : > { %1063 = vrot.lane.b32.xlu1 %v1050_v26, %s5975_s26  ;;  %v1656_v26 = vmul.f32 %v6456_v16, %v6342_v36  ;;  %v7423_v16 = vmov 0.0  }
 0x105   : > { %1279 = vrot.lane.b32.xlu0 %v1266_v29, %s5974_s23  ;;  %v6462_v29 = vpop.permute.xlu1 %2673 }
 0x108   : > { %1879 = vrot.lane.b32.xlu1 %v1868_v34, %s5972_s15  ;;  %v6467_v34 = vsel %vm7401_vm8, %v6324_v21, %v6330_v24  ;;  %v6491_v21 = vsel %vm493_vm9, %v6420_v28, %v6384_v58 }
 0x109   : > { %1665 = vrot.lane.b32.xlu0 %v1654_v41, %s5973_s18  ;;  %7414 = vst [vmem:[#allocation15_spill] sm:$0xff] %v6467_v34  ;;  %v6469_v41 = vpop.permute.xlu0 %2480  ;;  %v2082_v4 = vmul.f32 %v6467_v34, %v6332_v31  ;;  %7417 = vst [vmem:[#allocation18_spill] sm:$0xff] %v6491_v21  ;;  %v6495_v56 = vpop.permute.xlu1 %2677 }
 0x10c   : > { %1883 = vrot.lane.b32.xlu1 %v1870_v11, %s5972_s15  ;;  %v6481_v11 = vsel %vm7401_vm8, %v6364_v42, %v6336_v35 }
 0x10d   : > { %1669 = vrot.lane.b32.xlu0 %v1656_v26, %s5973_s18  ;;  %7416 = vst [vmem:[#allocation17_spill] sm:$0xff] %v6481_v11  ;;  %v2296_v26 = vmul.f32 %v6476_v15, %v6332_v31  ;;  %v2084_v34 = vmul.f32 %v6481_v11, %v6342_v36  ;;  %v6498_v30 = vpop.permute.xlu0 %2671  ;;  %v2295_v11 = vmul.f32 0.0, %v6392_v0 }
 0x110   : > { %3660 = vrot.lane.b32.xlu1 %v6192_v48, %s5985_s20  ;;  %v2298_v48 = vmul.f32 %v6491_v21, %v6342_v36  ;;  %v6599_v21 = vsel %vm1283_vm7, %v6314_v17, %v6306_v13  ;;  %v6616_v13 = vsel %vm7401_vm8, %v6330_v24, %v6364_v42  ;;  %v2491_v17 = vmul.f32 0.0, %v6411_v25 }
 0x111   : > { %2093 = vrot.lane.b32.xlu0 %v2082_v4, %s5971_s12  ;;  %v6504_v4 = vsel %vm464_vm2, %v6264_v54, %v6266_v55  ;;  %v477_v54 = vmul.f32 %v6278_v62, %v6344_v37  ;;  %7418 = vst [vmem:[#allocation19_spill] sm:$0xff] %v6599_v21  ;;  %7419 = vst [vmem:[#allocation20_spill] sm:$0xff] %v6616_v13 }
 0x112   : > { %v475_v15 = vmul.f32 %v6504_v4, %v6334_v33 }
 0x114   : > { %2307 = vrot.lane.b32.xlu1 %v2296_v26, %s5970_s7  ;;  %v6513_v26 = vpop.permute.xlu1 %2867 }
 0x115   : > { %2097 = vrot.lane.b32.xlu0 %v2084_v34, %s5971_s12  ;;  %v6515_v34 = vpop.permute.xlu0 %2675 }
 0x118   : > { %2311 = vrot.lane.b32.xlu1 %v2298_v48, %s5970_s7  ;;  %v6521_v55 = vpop.permute.xlu1 %2871 }
 0x119   : > { %487 = vrot.lane.b32.xlu0 %v475_v15, %s5977_s9  ;;  %v6525_v48 = vpop.permute.xlu0 %2869  ;;  %v6534_v15 = vsel %vm822_vm3, %v6283_v1, %v6274_v60 }
 0x11c   : > { %2305 = vrot.lane.b32.xlu1 %v2295_v11, %s5970_s7  ;;  %v6538_v11 = vpop.permute.xlu1 %1448 }
 0x11d   : > { %491 = vrot.lane.b32.xlu0 %v477_v54, %s5977_s9  ;;  %v6542_v54 = vpop.permute.xlu0 %2873 }
 0x120   : > { %3853 = vrot.lane.b32.xlu1 %v6200_v50, %s5986_s24  ;;  %v833_v50 = vmul.f32 %v6534_v15, %v6334_v33 }
 0x121   : > { %3658 = vrot.lane.b32.xlu0 %v6178_v45, %s5985_s20  ;;  %v835_v45 = vmul.f32 %v6288_v3, %v6344_v37  ;;  %v6555_v60 = vpop.permute.xlu0 %3064 }
 0x124   : > { %3857 = vrot.lane.b32.xlu1 %v6210_v52, %s5986_s24  ;;  %v6552_v52 = vpop.permute.xlu1 %3066 }
 0x125   : > { %3662 = vrot.lane.b32.xlu0 %v6187_v47, %s5985_s20  ;;  %v2680_v47 = vsel %vm2679_vm10, %v6498_v30, %v6462_v29 }
 0x126   : > { %v2689_v1 = vmul.f32 %v2680_v47, %v6332_v31  ;;  %v1051_v47 = vmul.f32 %v6298_v9, %v6344_v37 }
 0x128   : > { %845 = vrot.lane.b32.xlu1 %v833_v50, %s5976_s29 }
 0x129   : > { %3851 = vrot.lane.b32.xlu0 %v6205_v51, %s5986_s24  ;;  %v6562_v51 = vsel %vm1038_vm4, %v6293_v7, %v6286_v2  ;;  %v6578_v7 = vpop.permute.xlu0 %3068 }
 0x12a   : > { %v1049_v50 = vmul.f32 %v6562_v51, %v6334_v33 }
 0x12c   : > { %849 = vrot.lane.b32.xlu1 %v835_v45, %s5976_s29  ;;  %v6571_v45 = vsel %vm1254_vm5, %v6303_v12, %v6296_v8  ;;  %v1267_v8 = vmul.f32 %v6308_v14, %v6344_v37 }
 0x12d   : > { %3855 = vrot.lane.b32.xlu0 %v6215_v53, %s5986_s24  ;;  %v6574_v53 = vpop.permute.xlu1 %3070  ;;  %v1265_v2 = vmul.f32 %v6571_v45, %v6334_v33 }
 0x130   : > { %2700 = vrot.lane.b32.xlu1 %v2689_v1, %s5985_s20  ;;  %v2483_v1 = vsel %vm2482_vm11, %v6411_v25, %v6443_v46  ;;  %v2085_v25 = vmul.f32 %v6336_v35, %v6344_v37 }
 0x131   : > { %1061 = vrot.lane.b32.xlu0 %v1049_v50, %s5975_s26  ;;  %v2492_v12 = vmul.f32 %v2483_v1, %v6332_v31  ;;  %v2485_v50 = vsel %vm2482_vm11, %v6440_v43, %v6469_v41  ;;  %v6593_v0 = vpop.permute.xlu1 %3266 }
 0x132   : > { %v2494_v1 = vmul.f32 %v2485_v50, %v6342_v36  ;;  %v6626_v50 = vsel %vm1067_vm6, %v6320_v19, %v6328_v23  ;;  %v2484_v19 = vsel %vm2482_vm11, %v6443_v46, %v6440_v43  ;;  %v1871_v23 = vmul.f32 %v6322_v20, %v6344_v37 }
 0x133   : > { %7420 = vst [vmem:[#allocation21_spill] sm:$0xff] %v6626_v50  ;;  %v1869_v24 = vmul.f32 %v6626_v50, %v6334_v33 }
 0x134   : > { %1277 = vrot.lane.b32.xlu1 %v1265_v2, %s5974_s23  ;;  %v6601_v2 = vpop.permute.xlu0 %3268 }
 0x135   : > { %1065 = vrot.lane.b32.xlu0 %v1051_v47, %s5975_s26  ;;  %v1655_v47 = vmul.f32 %v6599_v21, %v6334_v33  ;;  %v6609_v10 = vpop.permute.xlu1 %3270 }
 0x138   : > { %1281 = vrot.lane.b32.xlu1 %v1267_v8, %s5974_s23  ;;  %v1657_v8 = vmul.f32 %v6318_v18, %v6344_v37 }
 0x139   : > { %2503 = vrot.lane.b32.xlu0 %v2492_v12, %s5986_s24  ;;  %v6619_v12 = vpop.permute.xlu0 %3272 }
 0x13a   : > { %v3276_v35 = vsel %vm3101_vm14, %v6609_v10, %v6619_v12 }
 0x13c   : > { %1667 = vrot.lane.b32.xlu1 %v1655_v47, %s5973_s18  ;;  %v6628_v47 = vpop.permute.xlu1 %3463 }
 0x13d   : > { %2507 = vrot.lane.b32.xlu0 %v2494_v1, %s5986_s24  ;;  %v2083_v1 = vmul.f32 %v6616_v13, %v6334_v33  ;;  %v6635_v42 = vpop.permute.xlu0 %3461 }
 0x13e   : > { %v3477_v13 = vmul.f32 %v6635_v42, %v6332_v31 }
 0x140   : > { %1671 = vrot.lane.b32.xlu1 %v1657_v8, %s5973_s18  ;;  %v6648_v8 = vsel %vm493_vm9, %v6360_v40, %v6420_v28  ;;  %v2495_v40 = vmul.f32 %v6469_v41, %v6344_v37  ;;  %v2682_v28 = vsel %vm2679_vm10, %v6515_v34, %v6495_v56 }
 0x141   : > { %2501 = vrot.lane.b32.xlu0 %v2491_v17, %s5986_s24  ;;  %7421 = vst [vmem:[#allocation22_spill] sm:$0xff] %v6648_v8  ;;  %v6650_v17 = vpop.permute.xlu1 %3467  ;;  %v2297_v43 = vmul.f32 %v6648_v8, %v6334_v33  ;;  %v2691_v41 = vmul.f32 %v2682_v28, %v6342_v36  ;;  %v2876_v28 = vsel %vm2875_vm12, %v6513_v26, %v6525_v48 }
 0x144   : > { %2095 = vrot.lane.b32.xlu1 %v2083_v1, %s5971_s12  ;;  %v2493_v1 = vmul.f32 %v2484_v19, %v6334_v33  ;;  %v2299_v19 = vmul.f32 %v6384_v58, %v6344_v37  ;;  %v2688_v58 = vmul.f32 0.0, %v6498_v30 }
 0x145   : > { %1881 = vrot.lane.b32.xlu0 %v1869_v24, %s5972_s15  ;;  %v6655_v24 = vpop.permute.xlu0 %3465  ;;  %v6659_v46 = vpop.permute.xlu1 %483 }
 0x148   : > { %2099 = vrot.lane.b32.xlu1 %v2085_v25, %s5971_s12 }
 0x149   : > { %1885 = vrot.lane.b32.xlu0 %v1871_v23, %s5972_s15  ;;  %v6668_v25 = vpop.permute.xlu0 %841  ;;  %v2681_v23 = vsel %vm2679_vm10, %v6462_v29, %v6515_v34  ;;  %v2877_v29 = vsel %vm2875_vm12, %v6525_v48, %v6521_v55  ;;  %v2692_v34 = vmul.f32 %v6495_v56, %v6344_v37  ;;  %v2878_v56 = vsel %vm2875_vm12, %v6521_v55, %v6542_v54 }
 0x14a   : > { %v2690_v8 = vmul.f32 %v2681_v23, %v6334_v33  ;;  %v2886_v30 = vmul.f32 %v2877_v29, %v6334_v33  ;;  %v2887_v29 = vmul.f32 %v2878_v56, %v6342_v36 }
 0x14c   : > { %2505 = vrot.lane.b32.xlu1 %v2493_v1, %s5986_s24  ;;  %v6677_v1 = vpop.permute.xlu1 %1057 }
 0x14d   : > { %2309 = vrot.lane.b32.xlu0 %v2297_v43, %s5970_s7  ;;  %v6680_v43 = vpop.permute.xlu0 %1273 }
 0x150   : > { %2509 = vrot.lane.b32.xlu1 %v2495_v40, %s5986_s24 }
 0x151   : > { %2313 = vrot.lane.b32.xlu0 %v2299_v19, %s5970_s7  ;;  %v6691_v40 = vpop.permute.xlu0 %1663  ;;  %v6696_v19 = vpop.permute.xlu1 %1877 }
 0x154   : > { %2704 = vrot.lane.b32.xlu1 %v2691_v41, %s5985_s20  ;;  %v3073_v41 = vsel %vm3072_vm13, %v6555_v60, %v6552_v52 }
 0x155   : > { %2702 = vrot.lane.b32.xlu0 %v2690_v8, %s5985_s20  ;;  %v2885_v8 = vmul.f32 %v2876_v28, %v6332_v31  ;;  %v6707_v48 = vpop.permute.xlu0 %2091  ;;  %v6709_v23 = vpop.permute.xlu1 %3656  ;;  %v2884_v28 = vmul.f32 0.0, %v6513_v26 }
 0x158   : > { %2698 = vrot.lane.b32.xlu1 %v2688_v58, %s5985_s20  ;;  %v2888_v58 = vmul.f32 %v6542_v54, %v6344_v37  ;;  %v3075_v54 = vsel %vm3072_vm13, %v6578_v7, %v6574_v53 }
 0x159   : > { %2706 = vrot.lane.b32.xlu0 %v2692_v34, %s5985_s20  ;;  %v3082_v34 = vmul.f32 %v3073_v41, %v6332_v31  ;;  %v3084_v56 = vmul.f32 %v3075_v54, %v6342_v36  ;;  %v3274_v54 = vsel %vm3101_vm14, %v6593_v0, %v6601_v2 }
 0x15c   : > { %2898 = vrot.lane.b32.xlu1 %v2886_v30, %s5984_s19 }
 0x15d   : > { %2896 = vrot.lane.b32.xlu0 %v2885_v8, %s5984_s19  ;;  %v3074_v8 = vsel %vm3072_vm13, %v6552_v52, %v6578_v7  ;;  %v3275_v7 = vsel %vm3101_vm14, %v6601_v2, %v6609_v10 }
 0x15e   : > { %v3083_v26 = vmul.f32 %v3074_v8, %v6334_v33 }
 0x160   : > { %2902 = vrot.lane.b32.xlu1 %v2888_v58, %s5984_s19 }
 0x161   : > { %2900 = vrot.lane.b32.xlu0 %v2887_v29, %s5984_s19  ;;  %v3081_v29 = vmul.f32 0.0, %v6555_v60  ;;  %v3284_v60 = vmul.f32 %v3275_v7, %v6342_v36  ;;  %v3469_v7 = vsel %vm2904_vm15, %v6635_v42, %v6628_v47 }
 0x162   : > { %v6719_v55 = vpop.permute.xlu1 %1450  ;;  %v3478_v10 = vmul.f32 %v3469_v7, %v6334_v33 }
 0x163   : > { %v6726_v30 = vpop.permute.xlu0 %1452 }
 0x164   : > { %3093 = vrot.lane.b32.xlu1 %v3082_v34, %s5983_s17 }
 0x165   : > { %2894 = vrot.lane.b32.xlu0 %v2884_v28, %s5984_s19  ;;  %v3085_v28 = vmul.f32 %v6574_v53, %v6344_v37  ;;  %v3286_v53 = vmul.f32 0.0, %v6619_v12  ;;  %v3282_v12 = vmul.f32 %v6593_v0, %v6332_v31 }
 0x166   : > { %v6734_v58 = vpop.permute.xlu1 %1454 }
 0x167   : > { %v6737_v41 = vpop.permute.xlu0 %1456 }
 0x168   : > { %3097 = vrot.lane.b32.xlu1 %v3084_v56, %s5983_s17  ;;  %v3283_v56 = vmul.f32 %v3274_v54, %v6334_v33 }
 0x169   : > { %3095 = vrot.lane.b32.xlu0 %v3083_v26, %s5983_s17 }
 0x16a   : > { %v486_v52 = vpop.permute.xlu1 %485 }
 0x16b   : > { %v6745_v34 = vpop.permute.xlu0 %843 }
 0x16c   : > { %3091 = vrot.lane.b32.xlu1 %v3081_v29, %s5983_s17  ;;  %v3285_v29 = vmul.f32 %v3276_v35, %v6344_v37  ;;  %v3471_v35 = vsel %vm2904_vm15, %v6655_v24, %v6650_v17 }
 0x16d   : > { %3099 = vrot.lane.b32.xlu0 %v3085_v28, %s5983_s17 }
 0x16e   : > { %v490_v8 = vpop.permute.xlu1 %489 }
 0x16f   : > { %v6756_v26 = vpop.permute.xlu0 %847 }
 0x170   : > { %3296 = vrot.lane.b32.xlu1 %v3284_v60, %s5982_s16 }
 0x171   : > { %3294 = vrot.lane.b32.xlu0 %v3283_v56, %s5982_s16  ;;  %v3470_v56 = vsel %vm2904_vm15, %v6628_v47, %v6655_v24  ;;  %v3481_v24 = vmul.f32 0.0, %v6650_v17  ;;  %v432_v17 = vld [vmem:[%s7375_s3] sm:$0xff] }
 0x172   : > { %v6764_v2 = vpop.permute.xlu1 %1059  ;;  %v3479_v0 = vmul.f32 %v3470_v56, %v6342_v36 }
 0x173   : > { %v6770_v28 = vpop.permute.xlu0 %1275 }
 0x174   : > { %3300 = vrot.lane.b32.xlu1 %v3286_v53, %s5982_s16  ;;  %v3480_v53 = vmul.f32 %v3471_v35, %v6344_v37 }
 0x175   : > { %3298 = vrot.lane.b32.xlu0 %v3285_v29, %s5982_s16 }
 0x176   : > { %v6775_v54 = vpop.permute.xlu1 %1063 }
 0x177   : > { %v6782_v60 = vpop.permute.xlu0 %1279 }
 0x178   : > { %3489 = vrot.lane.b32.xlu1 %v3478_v10, %s5980_s13 }
 0x179   : > { %3292 = vrot.lane.b32.xlu0 %v3282_v12, %s5982_s16 }
 0x17a   : > { %v6790_v29 = vpop.permute.xlu1 %1879 }
 0x17b   : > { %v6793_v7 = vpop.permute.xlu0 %1665 }
 0x17c   : > { %3493 = vrot.lane.b32.xlu1 %v3480_v53, %s5980_s13 }
 0x17d   : > { %3491 = vrot.lane.b32.xlu0 %v3479_v0, %s5980_s13 }
 0x17e   : > { %v6799_v47 = vpop.permute.xlu1 %1883 }
 0x17f   : > { %v6802_v10 = vpop.permute.xlu0 %1669 }
 0x180   : > { %3487 = vrot.lane.b32.xlu1 %v3477_v13, %s5980_s13  ;;  %v494_v13 = vsel %vm493_vm9, %v6659_v46, %v486_v52 }
 0x181   : > { %3495 = vrot.lane.b32.xlu0 %v3481_v24, %s5980_s13 }
 0x182   : > { %v3661_v12 = vpop.permute.xlu1 %3660 }
 0x183   : > { %v6806_v35 = vpop.permute.xlu0 %2093 }
 0x186   : > { %v6808_v56 = vpop.permute.xlu1 %2307 }
 0x187   : > { %v6810_v53 = vpop.permute.xlu0 %2097 }
 0x18a   : > { %v6812_v0 = vpop.permute.xlu1 %2311 }
 0x18b   : > { %v488_v42 = vpop.permute.xlu0 %487 }
 0x18c   : > { %v495_v20 = vsel %vm493_vm9, %v486_v52, %v488_v42 }
 0x18d   : > { %506 = vmatprep.subr.mxu0 %v495_v20  ;;  %v496_v20 = vsel %vm493_vm9, %v488_v42, %v490_v8 }
 0x18e   : > { %507 = vmatpush1.msra.mxu0 %v494_v13  ;;  %v6820_v24 = vpop.permute.xlu1 %2305 }
 0x18f   : > { %7422 = vst [vmem:[#allocation23_spill] sm:$0xff] %v6820_v24  ;;  %v492_v50 = vpop.permute.xlu0 %491  ;;  %5735 = vmatmul.mubr.msk.f32.vlgmr.msra.gmra.mrb[2].mxu0 %vm502_vm0, %v432_v17  ;;  %651 = vmatprep.subr.mxu0 %v6334_v33 }
 0x190   : > { %652 = vmatpush1.msra.mxu0 %v6332_v31  ;;  %v497_v18 = vsel %vm493_vm9, %v490_v8, %v492_v50  ;;  %715 = vmatprep.mubr.f32.mxu0 %v7423_v16 }
 0x191   : > { %577 = vmatprep.subr.mxu1 %v497_v18  ;;  %v5734_v18 = vld [vmem:[%s7375_s3 + $0x68] sm:$0xff] }
 0x192   : > { %578 = vmatpush1.msra.mxu1 %v496_v20  ;;  %v3854_v21 = vpop.permute.xlu1 %3853 }
 0x193   : > { %v3659_v46 = vpop.permute.xlu0 %3658  ;;  %5736 = vmatmul.mubr.msk.f32.vlgmr.msra.gmra.mrb[2].mxu1 %vm502_vm0, %v432_v17  ;;  %722 = vmatprep.subr.mxu1 %v6344_v37 }
 0x194   : > { %v3664_v52 = vsel %vm502_vm0, %v6709_v23, %v3659_v46  ;;  %v3665_v13 = vsel %vm502_vm0, %v3659_v46, %v3661_v12  ;;  %723 = vmatpush1.msra.mxu1 %v6342_v36  ;;  %786 = vmatprep.mubr.f32.mxu1 %v7423_v16 }
 0x195   : > { %v3673_v50 = vmul.f32 %v3664_v52, %v6334_v33  ;;  %v3674_v8 = vmul.f32 %v3665_v13, %v6342_v36 }
 0x196   : > { %v3858_v42 = vpop.permute.xlu1 %3857 }
 0x197   : > { %3684 = vrot.lane.b32.xlu0 %v3673_v50, %s5979_s11  ;;  %v3663_v17 = vpop.permute.xlu0 %3662  ;;  %5737 = vmatmul.mubr.msk.f32.vlgmr.msra.gmra.mrb[2].mxu0 %vm502_vm0, %v5734_v18 }
 0x198   : > { %v3666_v20 = vsel %vm502_vm0, %v3661_v12, %v3663_v17  ;;  %v3676_v46 = vmul.f32 0.0, %v3663_v17  ;;  %3686 = vrot.lane.b32.xlu1 %v3674_v8, %s5979_s11  ;;  %927 = vmatprep.mubr.f32.mxu0 %v7423_v16  ;;  %v852_v12 = vsel %vm7401_vm8, %v6668_v25, %v6745_v34  ;;  %v5739_v8 = vld [vmem:[%s7375_s3 + $0x8] sm:$0xff] }
 0x199   : > { %v3675_v32 = vmul.f32 %v3666_v20, %v6344_v37 }
 0x19a   : > { %v846_v24 = vpop.permute.xlu1 %845 }
 0x19b   : > { %v3852_v52 = vpop.permute.xlu0 %3851  ;;  %5738 = vmatmul.mubr.msk.f32.vlgmr.msra.gmra.mrb[2].mxu1 %vm502_vm0, %v5734_v18  ;;  %3688 = vrot.lane.b32.xlu0 %v3675_v32, %s5979_s11  ;;  %v853_v13 = vsel %vm7401_vm8, %v6745_v34, %v846_v24  ;;  %v3672_v18 = vmul.f32 %v6709_v23, %v6332_v31  ;;  %v854_v23 = vsel %vm7401_vm8, %v846_v24, %v6756_v26  ;;  %v3871_v24 = vmul.f32 0.0, %v3858_v42 }
 0x19c   : > { %v3859_v50 = vsel %vm2511_vm1, %v3852_v52, %v3854_v21  ;;  %3690 = vrot.lane.b32.xlu1 %v3676_v46, %s5979_s11  ;;  %863 = vmatprep.subr.mxu0 %v853_v13 }
 0x19d   : > { %v3868_v32 = vmul.f32 %v3859_v50, %v6334_v33  ;;  %864 = vmatpush1.msra.mxu0 %v852_v12  ;;  %998 = vmatprep.mubr.f32.mxu1 %v7423_v16 }
 0x19e   : > { %v850_v17 = vpop.permute.xlu1 %849 }
 0x19f   : > { %v3856_v20 = vpop.permute.xlu0 %3855  ;;  %3682 = vrot.lane.b32.xlu0 %v3672_v18, %s5979_s11  ;;  %5741 = vmatmul.mubr.msk.f32.vlgmr.msra.gmra.mrb[2].mxu0 %vm502_vm0, %v5739_v8  ;;  %v855_v25 = vsel %vm7401_vm8, %v6756_v26, %v850_v17  ;;  %v5743_v26 = vld [vmem:[%s7375_s3 + $0x10] sm:$0xff]  ;;  %v3867_v17 = vmul.f32 %v3852_v52, %v6332_v31  ;;  %vm1458_vm8 = vcmask 523264  }
 0x1a0   : > { %v3860_v34 = vsel %vm2511_vm1, %v3854_v21, %v3856_v20  ;;  %v3861_v46 = vsel %vm2511_vm1, %v3856_v20, %v3858_v42  ;;  %3879 = vrot.lane.b32.xlu1 %v3868_v32, %s5978_s10  ;;  %934 = vmatprep.subr.mxu1 %v855_v25  ;;  %v1068_v32 = vsel %vm1067_vm6, %v6677_v1, %v6764_v2 }
 0x1a1   : > { %v3869_v13 = vmul.f32 %v3860_v34, %v6342_v36  ;;  %v3870_v50 = vmul.f32 %v3861_v46, %v6344_v37  ;;  %935 = vmatpush1.msra.mxu1 %v854_v23  ;;  %1143 = vmatprep.mubr.f32.mxu0 %v7423_v16  ;;  %v1284_v1 = vsel %vm1283_vm7, %v6680_v43, %v6770_v28 }
 0x1a2   : > { %v6874_v12 = vpop.permute.xlu1 %2700  ;;  %v1460_v34 = vsel %vm1458_vm8, %v6719_v55, %v6726_v30  ;;  %v4048_v23 = vmul.f32 %v6504_v4, %v6342_v36  ;;  %v4049_v4 = vmul.f32 %v6373_v44, %v6344_v37  ;;  %v1459_v44 = vsel %vm1458_vm8, %v6538_v11, %v6719_v55 }
 0x1a3   : > { %v1062_v18 = vpop.permute.xlu0 %1061  ;;  %3881 = vrot.lane.b32.xlu0 %v3869_v13, %s5978_s10  ;;  %5742 = vmatmul.mubr.msk.f32.vlgmr.msra.gmra.mrb[2].mxu1 %vm502_vm0, %v5739_v8  ;;  %v1461_v11 = vsel %vm1458_vm8, %v6726_v30, %v6734_v58 }
 0x1a4   : > { %3883 = vrot.lane.b32.xlu1 %v3870_v50, %s5978_s10  ;;  %v1069_v21 = vsel %vm1067_vm6, %v6764_v2, %v1062_v18  ;;  %1214 = vmatprep.mubr.f32.mxu1 %v7423_v16  ;;  %v4047_v2 = vmul.f32 %v6353_v38, %v6334_v33  ;;  %v1070_v52 = vsel %vm1067_vm6, %v1062_v18, %v6775_v54  ;;  %v4050_v50 = vmul.f32 0.0, %v6278_v62 }
 0x1a5   : > { %1079 = vmatprep.subr.mxu0 %v1069_v21  ;;  %v4046_v62 = vmul.f32 %v6271_v59, %v6332_v31  ;;  %v5751_v59 = vld [vmem:[%s7375_s3 + $0x20] sm:$0xff] }
 0x1a6   : > { %1080 = vmatpush1.msra.mxu0 %v1068_v32  ;;  %v1278_v8 = vpop.permute.xlu1 %1277  ;;  %v4228_v32 = vmul.f32 %v6380_v49, %v6344_v37 }
 0x1a7   : > { %v1066_v20 = vpop.permute.xlu0 %1065  ;;  %3885 = vrot.lane.b32.xlu0 %v3871_v24, %s5978_s10  ;;  %5745 = vmatmul.mubr.msk.f32.vlgmr.msra.gmra.mrb[2].mxu0 %vm502_vm0, %v5743_v26  ;;  %v1285_v25 = vsel %vm1283_vm7, %v6770_v28, %v1278_v8  ;;  %v1286_v43 = vsel %vm1283_vm7, %v1278_v8, %v6782_v60  ;;  %v5747_v28 = vld [vmem:[%s7375_s3 + $0x18] sm:$0xff]  ;;  %v4229_v8 = vmul.f32 0.0, %v6288_v3 }
 0x1a8   : > { %3877 = vrot.lane.b32.xlu1 %v3867_v17, %s5978_s10  ;;  %1295 = vmatprep.subr.mxu0 %v1285_v25  ;;  %v1071_v42 = vsel %vm1067_vm6, %v6775_v54, %v1066_v20  ;;  %v1462_v54 = vsel %vm1458_vm8, %v6734_v58, %v6737_v41  ;;  %v1673_v17 = vsel %vm1254_vm5, %v6691_v40, %v6793_v7  ;;  %v5754_v40 = vld [vmem:[%s7375_s3 + $0x28] sm:$0xff] }
 0x1a9   : > { %1150 = vmatprep.subr.mxu1 %v1071_v42  ;;  %1296 = vmatpush1.msra.mxu0 %v1284_v1  ;;  %v4225_v20 = vmul.f32 %v6268_v57, %v6332_v31  ;;  %v4405_v57 = vmul.f32 %v6390_v61, %v6334_v33 }
 0x1aa   : > { %1151 = vmatpush1.msra.mxu1 %v1070_v52  ;;  %1470 = vmatprep.subr.mxu0 %v1460_v34  ;;  %v1282_v46 = vpop.permute.xlu1 %1281  ;;  %v4407_v52 = vmul.f32 %v6409_v22, %v6344_v37 }
 0x1ab   : > { %v6908_v13 = vpop.permute.xlu0 %2503  ;;  %4058 = vrot.lane.b32.xlu0 %v4047_v2, %s5977_s9  ;;  %5746 = vmatmul.mubr.msk.f32.vlgmr.msra.gmra.mrb[2].mxu1 %vm502_vm0, %v5743_v26  ;;  %v1287_v38 = vsel %vm1283_vm7, %v6782_v60, %v1282_v46  ;;  %v4226_v26 = vmul.f32 %v6358_v39, %v6334_v33  ;;  %v4227_v39 = vmul.f32 %v6534_v15, %v6342_v36 }
 0x1ac   : > { %4060 = vrot.lane.b32.xlu1 %v4048_v23, %s5977_s9  ;;  %1366 = vmatprep.subr.mxu1 %v1287_v38  ;;  %v1887_v2 = vsel %vm1038_vm4, %v6696_v19, %v6790_v29  ;;  %v4584_v23 = vmul.f32 %v6398_v6, %v6334_v33  ;;  %v4585_v6 = vmul.f32 %v6571_v45, %v6342_v36 }
 0x1ad   : > { %1367 = vmatpush1.msra.mxu1 %v1286_v43  ;;  %1359 = vmatprep.mubr.f32.mxu0 %v7423_v16  ;;  %v2101_v43 = vsel %vm822_vm3, %v6707_v48, %v6806_v35 }
 0x1ae   : > { %1541 = vmatprep.subr.mxu1 %v1462_v54  ;;  %v1668_v60 = vpop.permute.xlu1 %1667  ;;  %1430 = vmatprep.mubr.f32.mxu1 %v7423_v16  ;;  %v4587_v54 = vmul.f32 0.0, %v6308_v14 }
 0x1af   : > { %v6928_v18 = vpop.permute.xlu0 %2507  ;;  %4062 = vrot.lane.b32.xlu0 %v4049_v4, %s5977_s9  ;;  %5749 = vmatmul.mubr.msk.f32.vlgmr.msra.gmra.mrb[2].mxu0 %vm502_vm0, %v5747_v28  ;;  %v1674_v21 = vsel %vm1254_vm5, %v6793_v7, %v1668_v60  ;;  %v1675_v25 = vsel %vm1254_vm5, %v1668_v60, %v6802_v10  ;;  %v7424_v60 = vld [vmem:[#allocation23_spill] sm:$0xff] }
 0x1b0   : > { %4064 = vrot.lane.b32.xlu1 %v4050_v50, %s5977_s9  ;;  %1471 = vmatpush1.msra.mxu0 %v1459_v44  ;;  %v4583_v50 = vmul.f32 %v6290_v5, %v6332_v31  ;;  %v2315_v44 = vsel %vm464_vm2, %v7424_v60, %v6808_v56 }
 0x1b1   : > { %1684 = vmatprep.subr.mxu0 %v1674_v21  ;;  %1534 = vmatprep.mubr.f32.mxu0 %v7423_v16 }
 0x1b2   : > { %v1672_v41 = vpop.permute.xlu1 %1671 }
 0x1b3   : > { %v6943_v24 = vpop.permute.xlu0 %2501  ;;  %4056 = vrot.lane.b32.xlu0 %v4046_v62, %s5977_s9  ;;  %5750 = vmatmul.mubr.msk.f32.vlgmr.msra.gmra.mrb[2].mxu1 %vm502_vm0, %v5747_v28  ;;  %v1676_v55 = vsel %vm1254_vm5, %v6802_v10, %v1672_v41  ;;  %v4406_v10 = vmul.f32 %v6562_v51, %v6342_v36  ;;  %v4408_v51 = vmul.f32 0.0, %v6298_v9  ;;  %v4404_v9 = vmul.f32 %v6280_v63, %v6332_v31 }
 0x1b4   : > { %4237 = vrot.lane.b32.xlu1 %v4226_v26, %s5976_s29  ;;  %1542 = vmatpush1.msra.mxu1 %v1461_v11  ;;  %v4586_v28 = vmul.f32 %v6418_v27, %v6344_v37  ;;  %v5762_v27 = vld [vmem:[%s7375_s3 + $0x38] sm:$0xff]  ;;  %v5766_v26 = vld [vmem:[%s7375_s3 + $0x40] sm:$0xff]  ;;  %v2512_v11 = vsel %vm2511_vm1, %v6943_v24, %v6908_v13 }
 0x1b5   : > { %1755 = vmatprep.subr.mxu1 %v1676_v55  ;;  %1605 = vmatprep.mubr.f32.mxu1 %v7423_v16 }
 0x1b6   : > { %v6961_v30 = vpop.permute.xlu1 %2095 }
 0x1b7   : > { %v1882_v58 = vpop.permute.xlu0 %1881  ;;  %4239 = vrot.lane.b32.xlu0 %v4227_v39, %s5976_s29  ;;  %5752 = vmatmul.mubr.msk.f32.vlgmr.msra.gmra.mrb[2].mxu0 %vm502_vm0, %v5751_v59  ;;  %v2102_v61 = vsel %vm822_vm3, %v6806_v35, %v6961_v30  ;;  %v2103_v48 = vsel %vm822_vm3, %v6961_v30, %v6810_v53 }
 0x1b8   : > { %4241 = vrot.lane.b32.xlu1 %v4228_v32, %s5976_s29  ;;  %1685 = vmatpush1.msra.mxu0 %v1673_v17  ;;  %v1888_v15 = vsel %vm1038_vm4, %v6790_v29, %v1882_v58  ;;  %v1889_v46 = vsel %vm1038_vm4, %v1882_v58, %v6799_v47  ;;  %v5758_v29 = vld [vmem:[%s7375_s3 + $0x30] sm:$0xff]  ;;  %v5770_v17 = vld [vmem:[%s7375_s3 + $0x48] sm:$0xff] }
 0x1b9   : > { %1898 = vmatprep.subr.mxu0 %v1888_v15  ;;  %1748 = vmatprep.mubr.f32.mxu0 %v7423_v16 }
 0x1ba   : > { %v2100_v49 = vpop.permute.xlu1 %2099 }
 0x1bb   : > { %v1886_v42 = vpop.permute.xlu0 %1885  ;;  %4243 = vrot.lane.b32.xlu0 %v4229_v8, %s5976_s29  ;;  %5753 = vmatmul.mubr.msk.f32.vlgmr.msra.gmra.mrb[2].mxu1 %vm502_vm0, %v5751_v59  ;;  %v2104_v22 = vsel %vm822_vm3, %v6810_v53, %v2100_v49  ;;  %v7427_v8 = vld [vmem:[#allocation14_spill] sm:$0xff] }
 0x1bc   : > { %4235 = vrot.lane.b32.xlu1 %v4225_v20, %s5976_s29  ;;  %1756 = vmatpush1.msra.mxu1 %v1675_v25  ;;  %v1890_v3 = vsel %vm1038_vm4, %v6799_v47, %v1886_v42  ;;  %v4939_v49 = vmul.f32 %v7427_v8, %v6344_v37 }
 0x1bd   : > { %1969 = vmatprep.subr.mxu1 %v1890_v3  ;;  %1819 = vmatprep.mubr.f32.mxu1 %v7423_v16 }
 0x1be   : > { %v6988_v7 = vpop.permute.xlu1 %2505 }
 0x1bf   : > { %v2310_v1 = vpop.permute.xlu0 %2309  ;;  %4416 = vrot.lane.b32.xlu0 %v4405_v57, %s5975_s26  ;;  %5756 = vmatmul.mubr.msk.f32.vlgmr.msra.gmra.mrb[2].mxu0 %vm502_vm0, %v5754_v40  ;;  %v2513_v14 = vsel %vm2511_vm1, %v6908_v13, %v6988_v7  ;;  %v7425_v13 = vld [vmem:[#allocation12_spill] sm:$0xff]  ;;  %v2514_v32 = vsel %vm2511_vm1, %v6988_v7, %v6928_v18  ;;  %v7429_v7 = vld [vmem:[#allocation3_spill] sm:$0xff] }
 0x1c0   : > { %4418 = vrot.lane.b32.xlu1 %v4406_v10, %s5975_s26  ;;  %1899 = vmatpush1.msra.mxu0 %v1887_v2  ;;  %v2316_v63 = vsel %vm464_vm2, %v6808_v56, %v2310_v1  ;;  %v2317_v56 = vsel %vm464_vm2, %v2310_v1, %v6812_v0  ;;  %v4937_v24 = vmul.f32 %v7425_v13, %v6334_v33 }
 0x1c1   : > { %2112 = vmatprep.subr.mxu0 %v2102_v61  ;;  %1962 = vmatprep.mubr.f32.mxu0 %v7423_v16 }
 0x1c2   : > { %v2510_v34 = vpop.permute.xlu1 %2509 }
 0x1c3   : > { %v2314_v19 = vpop.permute.xlu0 %2313  ;;  %4420 = vrot.lane.b32.xlu0 %v4407_v52, %s5975_s26  ;;  %5757 = vmatmul.mubr.msk.f32.vlgmr.msra.gmra.mrb[2].mxu1 %vm502_vm0, %v5754_v40  ;;  %v2515_v41 = vsel %vm2511_vm1, %v6928_v18, %v2510_v34  ;;  %v7426_v18 = vld [vmem:[#allocation19_spill] sm:$0xff]  ;;  %v7428_v40 = vld [vmem:[#allocation5_spill] sm:$0xff] }
 0x1c4   : > { %4422 = vrot.lane.b32.xlu1 %v4408_v51, %s5975_s26  ;;  %1970 = vmatpush1.msra.mxu1 %v1889_v46  ;;  %v2318_v45 = vsel %vm464_vm2, %v6812_v0, %v2314_v19  ;;  %v4938_v15 = vmul.f32 %v7426_v18, %v6342_v36  ;;  %v4940_v57 = vmul.f32 0.0, %v7428_v40  ;;  %v5773_v52 = vld [vmem:[%s7375_s3 + $0x50] sm:$0xff]  ;;  %v7430_v51 = vld [vmem:[#allocation11_spill] sm:$0xff]  ;;  %v7444_v40 = vld [vmem:[#allocation10_spill] sm:$0xff] }
 0x1c5   : > { %2183 = vmatprep.subr.mxu1 %v2104_v22  ;;  %2033 = vmatprep.mubr.f32.mxu1 %v7423_v16  ;;  %v5116_v34 = vmul.f32 %v7430_v51, %v6334_v33  ;;  %v7431_v46 = vld [vmem:[#allocation21_spill] sm:$0xff] }
 0x1c6   : > { %v7018_v47 = vpop.permute.xlu1 %2704  ;;  %v5117_v19 = vmul.f32 %v7431_v46, %v6342_v36 }
 0x1c7   : > { %v7022_v38 = vpop.permute.xlu0 %2702  ;;  %4414 = vrot.lane.b32.xlu0 %v4404_v9, %s5975_s26  ;;  %5760 = vmatmul.mubr.msk.f32.vlgmr.msra.gmra.mrb[2].mxu0 %vm502_vm0, %v5758_v29 }
 0x1c8   : > { %4595 = vrot.lane.b32.xlu1 %v4584_v23, %s5974_s23  ;;  %2113 = vmatpush1.msra.mxu0 %v2101_v43  ;;  %v2709_v59 = vsel %vm502_vm0, %v6874_v12, %v7022_v38  ;;  %v2710_v10 = vsel %vm502_vm0, %v7022_v38, %v7018_v47  ;;  %v7433_v38 = vld [vmem:[#allocation6_spill] sm:$0xff] }
 0x1c9   : > { %2326 = vmatprep.subr.mxu0 %v2316_v63  ;;  %2176 = vmatprep.mubr.f32.mxu0 %v7423_v16  ;;  %v5119_v43 = vmul.f32 0.0, %v7433_v38 }
 0x1ca   : > { %v2699_v4 = vpop.permute.xlu1 %2698 }
 0x1cb   : > { %v2707_v35 = vpop.permute.xlu0 %2706  ;;  %4597 = vrot.lane.b32.xlu0 %v4585_v6, %s5974_s23  ;;  %5761 = vmatmul.mubr.msk.f32.vlgmr.msra.gmra.mrb[2].mxu1 %vm502_vm0, %v5758_v29  ;;  %v2708_v25 = vsel %vm502_vm0, %v2699_v4, %v6874_v12  ;;  %v4936_v12 = vmul.f32 %v7429_v7, %v6332_v31  ;;  %v5776_v4 = vld [vmem:[%s7375_s3 + $0x58] sm:$0xff] }
 0x1cc   : > { %4599 = vrot.lane.b32.xlu1 %v4586_v28, %s5974_s23  ;;  %2184 = vmatpush1.msra.mxu1 %v2103_v48  ;;  %v2711_v58 = vsel %vm502_vm0, %v7018_v47, %v2707_v35  ;;  %v7432_v47 = vld [vmem:[#allocation13_spill] sm:$0xff]  ;;  %v7434_v35 = vld [vmem:[#allocation4_spill] sm:$0xff] }
 0x1cd   : > { %2397 = vmatprep.subr.mxu1 %v2318_v45  ;;  %2247 = vmatprep.mubr.f32.mxu1 %v7423_v16  ;;  %v5118_v23 = vmul.f32 %v7432_v47, %v6344_v37  ;;  %v5115_v45 = vmul.f32 %v7434_v35, %v6332_v31 }
 0x1ce   : > { %v7050_v53 = vpop.permute.xlu1 %2898 }
 0x1cf   : > { %v7057_v21 = vpop.permute.xlu0 %2896  ;;  %4601 = vrot.lane.b32.xlu0 %v4587_v54, %s5974_s23  ;;  %5764 = vmatmul.mubr.msk.f32.vlgmr.msra.gmra.mrb[2].mxu0 %vm502_vm0, %v5762_v27 }
 0x1d0   : > { %4593 = vrot.lane.b32.xlu1 %v4583_v50, %s5974_s23  ;;  %2327 = vmatpush1.msra.mxu0 %v2315_v44  ;;  %v2906_v3 = vsel %vm2904_vm15, %v7057_v21, %v7050_v53  ;;  %v7436_v44 = vld [vmem:[#allocation20_spill] sm:$0xff] }
 0x1d1   : > { %2523 = vmatprep.subr.mxu0 %v2513_v14  ;;  %2390 = vmatprep.mubr.f32.mxu0 %v7423_v16  ;;  %v7437_v14 = vld [vmem:[#allocation17_spill] sm:$0xff] }
 0x1d2   : > { %v2903_v5 = vpop.permute.xlu1 %2902 }
 0x1d3   : > { %v7068_v62 = vpop.permute.xlu0 %2900  ;;  %4769 = vrot.lane.b32.xlu0 %v6334_v33, %s5981_s14  ;;  %5765 = vmatmul.mubr.msk.f32.vlgmr.msra.gmra.mrb[2].mxu1 %vm502_vm0, %v5762_v27  ;;  %v7435_v27 = vld [vmem:[#allocation15_spill] sm:$0xff] }
 0x1d4   : > { %4771 = vrot.lane.b32.xlu1 %v6342_v36, %s5981_s14  ;;  %2398 = vmatpush1.msra.mxu1 %v2317_v56  ;;  %v2908_v61 = vsel %vm2904_vm15, %v7068_v62, %v2903_v5  ;;  %v2907_v6 = vsel %vm2904_vm15, %v7050_v53, %v7068_v62  ;;  %v5295_v54 = vmul.f32 %v7435_v27, %v6334_v33 }
 0x1d5   : > { %2594 = vmatprep.subr.mxu1 %v2515_v41  ;;  %2461 = vmatprep.mubr.f32.mxu1 %v7423_v16  ;;  %v5297_v5 = vmul.f32 %v7437_v14, %v6344_v37 }
 0x1d6   : > { %v7081_v0 = vpop.permute.xlu1 %3093 }
 0x1d7   : > { %v2895_v55 = vpop.permute.xlu0 %2894  ;;  %4773 = vrot.lane.b32.xlu0 %v6344_v37, %s5981_s14  ;;  %5768 = vmatmul.mubr.msk.f32.vlgmr.msra.gmra.mrb[2].mxu0 %vm502_vm0, %v5766_v26 }
 0x1d8   : > { %4775 = vrot.lane.b32.xlu1 %v7423_v16, %s5981_s14  ;;  %2524 = vmatpush1.msra.mxu0 %v2512_v11  ;;  %v2905_v22 = vsel %vm2904_vm15, %v2895_v55, %v7057_v21  ;;  %v5296_v21 = vmul.f32 %v7436_v44, %v6342_v36 }
 0x1d9   : > { %2719 = vmatprep.subr.mxu0 %v2709_v59  ;;  %2587 = vmatprep.mubr.f32.mxu0 %v7423_v16  ;;  %v7439_v59 = vld [vmem:[#allocation7_spill] sm:$0xff] }
 0x1da   : > { %v7095_v39 = vpop.permute.xlu1 %3097 }
 0x1db   : > { %v7102_v30 = vpop.permute.xlu0 %3095  ;;  %4767 = vrot.lane.b32.xlu0 %v6332_v31, %s5981_s14  ;;  %5769 = vmatmul.mubr.msk.f32.vlgmr.msra.gmra.mrb[2].mxu1 %vm502_vm0, %v5766_v26  ;;  %v5779_v26 = vld [vmem:[%s7375_s3 + $0x60] sm:$0xff] }
 0x1dc   : > { %4948 = vrot.lane.b32.xlu1 %v4937_v24, %s5973_s18  ;;  %2595 = vmatpush1.msra.mxu1 %v2514_v32  ;;  %v3103_v9 = vsel %vm3101_vm14, %v7081_v0, %v7102_v30  ;;  %v3104_v56 = vsel %vm3101_vm14, %v7102_v30, %v7095_v39  ;;  %v7440_v32 = vld [vmem:[#allocation16_spill] sm:$0xff] }
 0x1dd   : > { %2790 = vmatprep.subr.mxu1 %v2711_v58  ;;  %2658 = vmatprep.mubr.f32.mxu1 %v7423_v16  ;;  %v5474_v30 = vmul.f32 %v7440_v32, %v6334_v33 }
 0x1de   : > { %v3092_v20 = vpop.permute.xlu1 %3091 }
 0x1df   : > { %v3100_v42 = vpop.permute.xlu0 %3099  ;;  %4950 = vrot.lane.b32.xlu0 %v4938_v15, %s5973_s18  ;;  %5771 = vmatmul.mubr.msk.f32.vlgmr.msra.gmra.mrb[2].mxu0 %vm502_vm0, %v5770_v17  ;;  %v3102_v53 = vsel %vm3101_vm14, %v3092_v20, %v7081_v0  ;;  %v7438_v0 = vld [vmem:[#allocation8_spill] sm:$0xff] }
 0x1e0   : > { %4952 = vrot.lane.b32.xlu1 %v4939_v49, %s5973_s18  ;;  %2720 = vmatpush1.msra.mxu0 %v2708_v25  ;;  %v3105_v28 = vsel %vm3101_vm14, %v7095_v39, %v3100_v42  ;;  %v5298_v11 = vmul.f32 0.0, %v7438_v0  ;;  %v5294_v39 = vmul.f32 %v7439_v59, %v6332_v31  ;;  %v5782_v49 = vld [vmem:[%s7375_s3 + $0x70] sm:$0xff]  ;;  %v5797_v0 = vld [vmem:[%s7375_s3 + $0x98] sm:$0xff] }
 0x1e1   : > { %2916 = vmatprep.subr.mxu0 %v2906_v3  ;;  %2783 = vmatprep.mubr.f32.mxu0 %v7423_v16  ;;  %v7443_v25 = vld [vmem:[#allocation9_spill] sm:$0xff] }
 0x1e2   : > { %v7135_v2 = vpop.permute.xlu1 %3296  ;;  %v5477_v42 = vmul.f32 0.0, %v7443_v25 }
 0x1e3   : > { %v3295_v1 = vpop.permute.xlu0 %3294  ;;  %4954 = vrot.lane.b32.xlu0 %v4940_v57, %s5973_s18  ;;  %5772 = vmatmul.mubr.msk.f32.vlgmr.msra.gmra.mrb[2].mxu1 %vm502_vm0, %v5770_v17  ;;  %v7441_v17 = vld [vmem:[#allocation22_spill] sm:$0xff]  ;;  %v5473_v57 = vmul.f32 %v7444_v40, %v6332_v31 }
 0x1e4   : > { %4946 = vrot.lane.b32.xlu1 %v4936_v12, %s5973_s18  ;;  %2791 = vmatpush1.msra.mxu1 %v2710_v10  ;;  %v3303_v60 = vsel %vm3072_vm13, %v3295_v1, %v7135_v2  ;;  %v5475_v18 = vmul.f32 %v7441_v17, %v6342_v36  ;;  %v7442_v36 = vld [vmem:[#allocation18_spill] sm:$0xff]  ;;  %v5800_v17 = vld [vmem:[%s7375_s3 + $0xa0] sm:$0xff] }
 0x1e5   : > { %2987 = vmatprep.subr.mxu1 %v2908_v61  ;;  %2854 = vmatprep.mubr.f32.mxu1 %v7423_v16  ;;  %v5476_v20 = vmul.f32 %v7442_v36, %v6344_v37  ;;  %v5650_v37 = vld [vmem:[%s7376_s4] sm:$0xff]  ;;  %v5785_v31 = vld [vmem:[%s7375_s3 + $0x78] sm:$0xff] }
 0x1e6   : > { %v3301_v63 = vpop.permute.xlu1 %3300 }
 0x1e7   : > { %v3299_v29 = vpop.permute.xlu0 %3298  ;;  %5127 = vrot.lane.b32.xlu0 %v5116_v34, %s5972_s15  ;;  %5774 = vmatmul.mubr.msk.f32.vlgmr.msra.gmra.mrb[2].mxu0 %vm502_vm0, %v5773_v52  ;;  %v5788_v34 = vld [vmem:[%s7375_s3 + $0x80] sm:$0xff] }
 0x1e8   : > { %5129 = vrot.lane.b32.xlu1 %v5117_v19, %s5972_s15  ;;  %2917 = vmatpush1.msra.mxu0 %v2905_v22  ;;  %v3305_v41 = vsel %vm3072_vm13, %v3299_v29, %v3301_v63  ;;  %v3304_v15 = vsel %vm3072_vm13, %v7135_v2, %v3299_v29  ;;  %v5791_v63 = vld [vmem:[%s7375_s3 + $0x88] sm:$0xff] }
 0x1e9   : > { %3113 = vmatprep.subr.mxu0 %v3103_v9  ;;  %2980 = vmatprep.mubr.f32.mxu0 %v7423_v16 }
 0x1ea   : > { %v3490_v50 = vpop.permute.xlu1 %3489 }
 0x1eb   : > { %5131 = vrot.lane.b32.xlu0 %v5118_v23, %s5972_s15  ;;  %5775 = vmatmul.mubr.msk.f32.vlgmr.msra.gmra.mrb[2].mxu1 %vm502_vm0, %v5773_v52  ;;  %v3293_v48 = vpop.permute.xlu0 %3292 }
 0x1ec   : > { %5133 = vrot.lane.b32.xlu1 %v5119_v43, %s5972_s15  ;;  %2988 = vmatpush1.msra.mxu1 %v2907_v6  ;;  %v3302_v13 = vsel %vm3072_vm13, %v3293_v48, %v3295_v1 }
 0x1ed   : > { %3184 = vmatprep.subr.mxu1 %v3105_v28  ;;  %3051 = vmatprep.mubr.f32.mxu1 %v7423_v16 }
 0x1ee   : > { %v3494_v55 = vpop.permute.xlu1 %3493 }
 0x1ef   : > { %5125 = vrot.lane.b32.xlu0 %v5115_v45, %s5972_s15  ;;  %5777 = vmatmul.mubr.msk.f32.vlgmr.msra.gmra.mrb[2].mxu0 %vm502_vm0, %v5776_v4  ;;  %v3492_v62 = vpop.permute.xlu0 %3491 }
 0x1f0   : > { %5306 = vrot.lane.b32.xlu1 %v5295_v54, %s5971_s12  ;;  %3114 = vmatpush1.msra.mxu0 %v3102_v53  ;;  %v3498_v24 = vsel %vm2875_vm12, %v3490_v50, %v3492_v62  ;;  %v3499_v7 = vsel %vm2875_vm12, %v3492_v62, %v3494_v55 }
 0x1f1   : > { %3313 = vmatprep.subr.mxu0 %v3303_v60  ;;  %3177 = vmatprep.mubr.f32.mxu0 %v7423_v16 }
 0x1f2   : > { %v3488_v8 = vpop.permute.xlu1 %3487 }
 0x1f3   : > { %5308 = vrot.lane.b32.xlu0 %v5296_v21, %s5971_s12  ;;  %5778 = vmatmul.mubr.msk.f32.vlgmr.msra.gmra.mrb[2].mxu1 %vm502_vm0, %v5776_v4  ;;  %v3496_v58 = vpop.permute.xlu0 %3495  ;;  %v3497_v3 = vsel %vm2875_vm12, %v3488_v8, %v3490_v50  ;;  %v5794_v50 = vld [vmem:[%s7375_s3 + $0x90] sm:$0xff] }
 0x1f4   : > { %5310 = vrot.lane.b32.xlu1 %v5297_v5, %s5971_s12  ;;  %3185 = vmatpush1.msra.mxu1 %v3104_v56  ;;  %v3500_v33 = vsel %vm2875_vm12, %v3494_v55, %v3496_v58 }
 0x1f5   : > { %3384 = vmatprep.subr.mxu1 %v3305_v41  ;;  %3248 = vmatprep.mubr.f32.mxu1 %v7423_v16 }
 0x1f7   : > { %5312 = vrot.lane.b32.xlu0 %v5298_v11, %s5971_s12  ;;  %5780 = vmatmul.mubr.msk.f32.vlgmr.msra.gmra.mrb[2].mxu0 %vm502_vm0, %v5779_v26 }
 0x1f8   : > { %5304 = vrot.lane.b32.xlu1 %v5294_v39, %s5971_s12  ;;  %3314 = vmatpush1.msra.mxu0 %v3302_v13 }
 0x1f9   : > { %3508 = vmatprep.subr.mxu0 %v3498_v24  ;;  %3377 = vmatprep.mubr.f32.mxu0 %v7423_v16 }
 0x1fb   : > { %5485 = vrot.lane.b32.xlu0 %v5474_v30, %s5970_s7  ;;  %5781 = vmatmul.mubr.msk.f32.vlgmr.msra.gmra.mrb[2].mxu1 %vm502_vm0, %v5779_v26 }
 0x1fc   : > { %5487 = vrot.lane.b32.xlu1 %v5475_v18, %s5970_s7  ;;  %3385 = vmatpush1.msra.mxu1 %v3304_v15 }
 0x1fd   : > { %3579 = vmatprep.subr.mxu1 %v3500_v33  ;;  %3448 = vmatprep.mubr.f32.mxu1 %v7423_v16 }
 0x1ff   : > { %5489 = vrot.lane.b32.xlu0 %v5476_v20, %s5970_s7  ;;  %5783 = vmatmul.mubr.msk.f32.vlgmr.msra.gmra.mrb[2].mxu0 %vm502_vm0, %v5782_v49 }
 0x200   : > { %5491 = vrot.lane.b32.xlu1 %v5477_v42, %s5970_s7  ;;  %3509 = vmatpush1.msra.mxu0 %v3497_v3  ;;  %v5803_v3 = vld [vmem:[%s7375_s3 + $0xa8] sm:$0xff] }
 0x201   : > { %3572 = vmatprep.mubr.f32.mxu0 %v7423_v16 }
 0x203   : > { %5483 = vrot.lane.b32.xlu0 %v5473_v57, %s5970_s7  ;;  %5784 = vmatmul.mubr.msk.f32.vlgmr.msra.gmra.mrb[2].mxu1 %vm502_vm0, %v5782_v49  ;;  %s5824_s7 = sshll.u32 %s7450_s22, 5 }
 0x204   : > { %3580 = vmatpush1.msra.mxu1 %v3499_v7  ;;  %3643 = vmatprep.mubr.f32.mxu1 %v7423_v16  ;;  %s251_s25 = scalar_lea.vmem %s7378_s6, %s5824_s7 }
 0x205   : > { %5653 = vperm.xlu1 %5957, %v5650_v37  }
 0x207   : > { %5786 = vmatmul.mubr.msk.f32.vlgmr.msra.gmra.mrb[2].mxu0 %vm502_vm0, %v5785_v31 }
 0x208   : > { %3767 = vmatprep.mubr.f32.mxu0 %v7423_v16 }
 0x209   : > { %v3685_v12 = vpop.permute.xlu0 %3684 }
 0x20a   : > { %v3687_v10 = vpop.permute.xlu1 %3686 }
 0x20b   : > { %v3693_v1 = vsel %vm2679_vm10, %v3685_v12, %v3687_v10  ;;  %5787 = vmatmul.mubr.msk.f32.vlgmr.msra.gmra.mrb[2].mxu1 %vm502_vm0, %v5785_v31 }
 0x20c   : > { %3703 = vmatprep.subr.mxu0 %v3693_v1  ;;  %3838 = vmatprep.mubr.f32.mxu1 %v7423_v16 }
 0x20d   : > { %v3689_v2 = vpop.permute.xlu0 %3688 }
 0x20e   : > { %v3694_v61 = vsel %vm2679_vm10, %v3687_v10, %v3689_v2  ;;  %v3691_v52 = vpop.permute.xlu1 %3690 }
 0x20f   : > { %v3695_v51 = vsel %vm2679_vm10, %v3689_v2, %v3691_v52 }
 0x210   : > { %3774 = vmatprep.subr.mxu1 %v3695_v51 }
 0x211   : > { %3775 = vmatpush1.msra.mxu1 %v3694_v61  ;;  %v3683_v46 = vpop.permute.xlu0 %3682  ;;  %v5806_v61 = vld [vmem:[%s7375_s3 + $0xb0] sm:$0xff] }
 0x212   : > { %v3692_v19 = vsel %vm2679_vm10, %v3683_v46, %v3685_v12  ;;  %v3880_v22 = vpop.permute.xlu1 %3879  ;;  %vm7445_vm10 = vcmask 588800  }
 0x213   : > { %3704 = vmatpush1.msra.mxu0 %v3692_v19  ;;  %5790 = vmatmul.mubr.msk.f32.vlgmr.msra.gmra.mrb[2].mxu1 %vm502_vm0, %v5788_v34 }
 0x214   : > { %5789 = vmatmul.mubr.msk.f32.vlgmr.msra.gmra.mrb[2].mxu0 %vm502_vm0, %v5788_v34  ;;  %4033 = vmatprep.mubr.f32.mxu1 %v7423_v16 }
 0x215   : > { %v3882_v29 = vpop.permute.xlu0 %3881  ;;  %3962 = vmatprep.mubr.f32.mxu0 %v7423_v16 }
 0x216   : > { %v3884_v9 = vpop.permute.xlu1 %3883  ;;  %v3888_v47 = vsel %vm2482_vm11, %v3880_v22, %v3882_v29 }
 0x217   : > { %3898 = vmatprep.subr.mxu0 %v3888_v47  ;;  %v3889_v6 = vsel %vm2482_vm11, %v3882_v29, %v3884_v9 }
 0x219   : > { %v3886_v23 = vpop.permute.xlu0 %3885 }
 0x21a   : > { %v3878_v38 = vpop.permute.xlu1 %3877  ;;  %v3890_v43 = vsel %vm2482_vm11, %v3884_v9, %v3886_v23  ;;  %v5809_v23 = vld [vmem:[%s7375_s3 + $0xb8] sm:$0xff] }
 0x21b   : > { %v3887_v28 = vsel %vm2482_vm11, %v3878_v38, %v3880_v22  ;;  %3969 = vmatprep.subr.mxu1 %v3890_v43  ;;  %vm7446_vm11 = vmmov %vm7445_vm10 }
 0x21c   : > { %3899 = vmatpush1.msra.mxu0 %v3887_v28  ;;  %3970 = vmatpush1.msra.mxu1 %v3889_v6 }
 0x21d   : > { %v4059_v4 = vpop.permute.xlu0 %4058  ;;  %5793 = vmatmul.mubr.msk.f32.vlgmr.msra.gmra.mrb[2].mxu1 %vm502_vm0, %v5791_v63  ;;  %5792 = vmatmul.mubr.msk.f32.vlgmr.msra.gmra.mrb[2].mxu0 %vm502_vm0, %v5791_v63 }
 0x21e   : > { %v4061_v48 = vpop.permute.xlu1 %4060  ;;  %4141 = vmatprep.mubr.f32.mxu0 %v7423_v16  ;;  %4212 = vmatprep.mubr.f32.mxu1 %v7423_v16 }
 0x21f   : > { %v4067_v35 = vsel %vm493_vm9, %v4059_v4, %v4061_v48 }
 0x220   : > { %4077 = vmatprep.subr.mxu0 %v4067_v35 }
 0x221   : > { %v4063_v45 = vpop.permute.xlu0 %4062 }
 0x222   : > { %v4068_v27 = vsel %vm493_vm9, %v4061_v48, %v4063_v45  ;;  %v4065_v54 = vpop.permute.xlu1 %4064 }
 0x223   : > { %v4069_v53 = vsel %vm493_vm9, %v4063_v45, %v4065_v54 }
 0x224   : > { %4148 = vmatprep.subr.mxu1 %v4069_v53 }
 0x225   : > { %4149 = vmatpush1.msra.mxu1 %v4068_v27  ;;  %v4057_v60 = vpop.permute.xlu0 %4056  ;;  %v5812_v27 = vld [vmem:[%s7375_s3 + $0xc0] sm:$0xff] }
 0x226   : > { %v4066_v44 = vsel %vm493_vm9, %v4057_v60, %v4059_v4  ;;  %v4238_v21 = vpop.permute.xlu1 %4237  ;;  %5796 = vmatmul.mubr.msk.f32.vlgmr.msra.gmra.mrb[2].mxu1 %vm502_vm0, %v5794_v50  ;;  %vm7447_vm9 = vmmov %vm7445_vm10 }
 0x227   : > { %4078 = vmatpush1.msra.mxu0 %v4066_v44  ;;  %4391 = vmatprep.mubr.f32.mxu1 %v7423_v16  ;;  %vm7448_vm12 = vmmov %vm7447_vm9 }
 0x228   : > { %5795 = vmatmul.mubr.msk.f32.vlgmr.msra.gmra.mrb[2].mxu0 %vm502_vm0, %v5794_v50 }
 0x229   : > { %v4240_v14 = vpop.permute.xlu0 %4239  ;;  %4320 = vmatprep.mubr.f32.mxu0 %v7423_v16 }
 0x22a   : > { %v4242_v5 = vpop.permute.xlu1 %4241  ;;  %v4246_v56 = vsel %vm7445_vm10, %v4238_v21, %v4240_v14 }
 0x22b   : > { %4256 = vmatprep.subr.mxu0 %v4246_v56  ;;  %v4247_v11 = vsel %vm7447_vm9, %v4240_v14, %v4242_v5 }
 0x22d   : > { %v4244_v62 = vpop.permute.xlu0 %4243 }
 0x22e   : > { %v4236_v41 = vpop.permute.xlu1 %4235  ;;  %v4248_v26 = vsel %vm7446_vm11, %v4242_v5, %v4244_v62  ;;  %v5815_v62 = vld [vmem:[%s7375_s3 + $0xc8] sm:$0xff] }
 0x22f   : > { %v4245_v55 = vsel %vm7448_vm12, %v4236_v41, %v4238_v21  ;;  %4327 = vmatprep.subr.mxu1 %v4248_v26 }
 0x230   : > { %4257 = vmatpush1.msra.mxu0 %v4245_v55  ;;  %4328 = vmatpush1.msra.mxu1 %v4247_v11 }
 0x231   : > { %v4417_v59 = vpop.permute.xlu0 %4416  ;;  %5799 = vmatmul.mubr.msk.f32.vlgmr.msra.gmra.mrb[2].mxu1 %vm502_vm0, %v5797_v0  ;;  %5798 = vmatmul.mubr.msk.f32.vlgmr.msra.gmra.mrb[2].mxu0 %vm502_vm0, %v5797_v0 }
 0x232   : > { %v4419_v39 = vpop.permute.xlu1 %4418  ;;  %4499 = vmatprep.mubr.f32.mxu0 %v7423_v16  ;;  %4570 = vmatprep.mubr.f32.mxu1 %v7423_v16 }
 0x233   : > { %v4425_v13 = vsel %vm1067_vm6, %v4417_v59, %v4419_v39 }
 0x234   : > { %4435 = vmatprep.subr.mxu0 %v4425_v13 }
 0x235   : > { %v4421_v24 = vpop.permute.xlu0 %4420 }
 0x236   : > { %v4426_v32 = vsel %vm1067_vm6, %v4419_v39, %v4421_v24  ;;  %v4423_v30 = vpop.permute.xlu1 %4422 }
 0x237   : > { %v4427_v58 = vsel %vm1067_vm6, %v4421_v24, %v4423_v30 }
 0x238   : > { %4506 = vmatprep.subr.mxu1 %v4427_v58 }
 0x239   : > { %4507 = vmatpush1.msra.mxu1 %v4426_v32  ;;  %v4415_v18 = vpop.permute.xlu0 %4414  ;;  %v5818_v32 = vld [vmem:[%s7375_s3 + $0xd0] sm:$0xff] }
 0x23a   : > { %v4424_v15 = vsel %vm1067_vm6, %v4415_v18, %v4417_v59  ;;  %v4596_v8 = vpop.permute.xlu1 %4595  ;;  %5802 = vmatmul.mubr.msk.f32.vlgmr.msra.gmra.mrb[2].mxu1 %vm502_vm0, %v5800_v17 }
 0x23b   : > { %4436 = vmatpush1.msra.mxu0 %v4424_v15  ;;  %4749 = vmatprep.mubr.f32.mxu1 %v7423_v16 }
 0x23c   : > { %5801 = vmatmul.mubr.msk.f32.vlgmr.msra.gmra.mrb[2].mxu0 %vm502_vm0, %v5800_v17 }
 0x23d   : > { %v4598_v33 = vpop.permute.xlu0 %4597  ;;  %4678 = vmatprep.mubr.f32.mxu0 %v7423_v16 }
 0x23e   : > { %v4600_v49 = vpop.permute.xlu1 %4599  ;;  %v4604_v36 = vsel %vm1283_vm7, %v4596_v8, %v4598_v33 }
 0x23f   : > { %4614 = vmatprep.subr.mxu0 %v4604_v36  ;;  %v4605_v40 = vsel %vm1283_vm7, %v4598_v33, %v4600_v49 }
 0x241   : > { %v4602_v20 = vpop.permute.xlu0 %4601 }
 0x242   : > { %v4594_v25 = vpop.permute.xlu1 %4593  ;;  %v4606_v42 = vsel %vm1283_vm7, %v4600_v49, %v4602_v20 }
 0x243   : > { %v4603_v57 = vsel %vm1283_vm7, %v4594_v25, %v4596_v8  ;;  %4685 = vmatprep.subr.mxu1 %v4606_v42 }
 0x244   : > { %4615 = vmatpush1.msra.mxu0 %v4603_v57  ;;  %4686 = vmatpush1.msra.mxu1 %v4605_v40 }
 0x245   : > { %v4770_v37 = vpop.permute.xlu0 %4769  ;;  %5805 = vmatmul.mubr.msk.f32.vlgmr.msra.gmra.mrb[2].mxu1 %vm502_vm0, %v5803_v3  ;;  %5804 = vmatmul.mubr.msk.f32.vlgmr.msra.gmra.mrb[2].mxu0 %vm502_vm0, %v5803_v3 }
 0x246   : > { %v4772_v7 = vpop.permute.xlu1 %4771  ;;  %4923 = vmatprep.mubr.f32.mxu1 %v7423_v16  ;;  %4852 = vmatprep.mubr.f32.mxu0 %v7423_v16 }
 0x247   : > { %v4778_v31 = vsel %vm1458_vm8, %v4770_v37, %v4772_v7 }
 0x248   : > { %4788 = vmatprep.subr.mxu0 %v4778_v31 }
 0x249   : > { %v4774_v12 = vpop.permute.xlu0 %4773 }
 0x24a   : > { %v4779_v10 = vsel %vm1458_vm8, %v4772_v7, %v4774_v12  ;;  %v4776_v1 = vpop.permute.xlu1 %4775 }
 0x24b   : > { %v4780_v2 = vsel %vm1458_vm8, %v4774_v12, %v4776_v1 }
 0x24c   : > { %4859 = vmatprep.subr.mxu1 %v4780_v2 }
 0x24d   : > { %4860 = vmatpush1.msra.mxu1 %v4779_v10  ;;  %v4768_v52 = vpop.permute.xlu0 %4767 }
 0x24e   : > { %v4777_v51 = vsel %vm1458_vm8, %v4768_v52, %v4770_v37  ;;  %v4949_v34 = vpop.permute.xlu1 %4948  ;;  %5808 = vmatmul.mubr.msk.f32.vlgmr.msra.gmra.mrb[2].mxu1 %vm502_vm0, %v5806_v61 }
 0x24f   : > { %4789 = vmatpush1.msra.mxu0 %v4777_v51  ;;  %5102 = vmatprep.mubr.f32.mxu1 %v7423_v16 }
 0x250   : > { %5807 = vmatmul.mubr.msk.f32.vlgmr.msra.gmra.mrb[2].mxu0 %vm502_vm0, %v5806_v61 }
 0x251   : > { %v4951_v46 = vpop.permute.xlu0 %4950  ;;  %5031 = vmatprep.mubr.f32.mxu0 %v7423_v16 }
 0x252   : > { %v4953_v19 = vpop.permute.xlu1 %4952  ;;  %v4957_v22 = vsel %vm1254_vm5, %v4949_v34, %v4951_v46 }
 0x253   : > { %4967 = vmatprep.subr.mxu0 %v4957_v22  ;;  %v4958_v38 = vsel %vm1254_vm5, %v4951_v46, %v4953_v19 }
 0x255   : > { %v4955_v29 = vpop.permute.xlu0 %4954 }
 0x256   : > { %v4947_v9 = vpop.permute.xlu1 %4946  ;;  %v4959_v47 = vsel %vm1254_vm5, %v4953_v19, %v4955_v29 }
 0x257   : > { %v4956_v43 = vsel %vm1254_vm5, %v4947_v9, %v4949_v34  ;;  %5038 = vmatprep.subr.mxu1 %v4959_v47 }
 0x258   : > { %4968 = vmatpush1.msra.mxu0 %v4956_v43  ;;  %5039 = vmatpush1.msra.mxu1 %v4958_v38 }
 0x259   : > { %v5128_v63 = vpop.permute.xlu0 %5127  ;;  %5811 = vmatmul.mubr.msk.f32.vlgmr.msra.gmra.mrb[2].mxu1 %vm502_vm0, %v5809_v23  ;;  %5810 = vmatmul.mubr.msk.f32.vlgmr.msra.gmra.mrb[2].mxu0 %vm502_vm0, %v5809_v23 }
 0x25a   : > { %v5130_v6 = vpop.permute.xlu1 %5129  ;;  %5281 = vmatprep.mubr.f32.mxu1 %v7423_v16  ;;  %5210 = vmatprep.mubr.f32.mxu0 %v7423_v16 }
 0x25b   : > { %v5136_v28 = vsel %vm1038_vm4, %v5128_v63, %v5130_v6 }
 0x25c   : > { %5146 = vmatprep.subr.mxu0 %v5136_v28 }
 0x25d   : > { %v5132_v4 = vpop.permute.xlu0 %5131 }
 0x25e   : > { %v5137_v48 = vsel %vm1038_vm4, %v5130_v6, %v5132_v4  ;;  %v5134_v35 = vpop.permute.xlu1 %5133 }
 0x25f   : > { %v5138_v45 = vsel %vm1038_vm4, %v5132_v4, %v5134_v35 }
 0x260   : > { %5217 = vmatprep.subr.mxu1 %v5138_v45 }
 0x261   : > { %5218 = vmatpush1.msra.mxu1 %v5137_v48  ;;  %v5126_v54 = vpop.permute.xlu0 %5125 }
 0x262   : > { %v5135_v53 = vsel %vm1038_vm4, %v5126_v54, %v5128_v63  ;;  %v5307_v50 = vpop.permute.xlu1 %5306  ;;  %5814 = vmatmul.mubr.msk.f32.vlgmr.msra.gmra.mrb[2].mxu1 %vm502_vm0, %v5812_v27 }
 0x263   : > { %5147 = vmatpush1.msra.mxu0 %v5135_v53  ;;  %5460 = vmatprep.mubr.f32.mxu1 %v7423_v16 }
 0x264   : > { %5813 = vmatmul.mubr.msk.f32.vlgmr.msra.gmra.mrb[2].mxu0 %vm502_vm0, %v5812_v27 }
 0x265   : > { %v5309_v60 = vpop.permute.xlu0 %5308  ;;  %5389 = vmatprep.mubr.f32.mxu0 %v7423_v16 }
 0x266   : > { %v5311_v44 = vpop.permute.xlu1 %5310  ;;  %v5315_v21 = vsel %vm822_vm3, %v5307_v50, %v5309_v60 }
 0x267   : > { %5325 = vmatprep.subr.mxu0 %v5315_v21  ;;  %v5316_v41 = vsel %vm822_vm3, %v5309_v60, %v5311_v44 }
 0x269   : > { %v5313_v14 = vpop.permute.xlu0 %5312 }
 0x26a   : > { %v5305_v5 = vpop.permute.xlu1 %5304  ;;  %v5317_v56 = vsel %vm822_vm3, %v5311_v44, %v5313_v14 }
 0x26b   : > { %v5314_v26 = vsel %vm822_vm3, %v5305_v5, %v5307_v50  ;;  %5396 = vmatprep.subr.mxu1 %v5317_v56 }
 0x26c   : > { %5326 = vmatpush1.msra.mxu0 %v5314_v26  ;;  %5397 = vmatpush1.msra.mxu1 %v5316_v41 }
 0x26d   : > { %v5486_v0 = vpop.permute.xlu0 %5485  ;;  %5817 = vmatmul.mubr.msk.f32.vlgmr.msra.gmra.mrb[2].mxu1 %vm502_vm0, %v5815_v62  ;;  %5816 = vmatmul.mubr.msk.f32.vlgmr.msra.gmra.mrb[2].mxu0 %vm502_vm0, %v5815_v62 }
 0x26e   : > { %v5488_v11 = vpop.permute.xlu1 %5487  ;;  %5639 = vmatprep.mubr.f32.mxu1 %v7423_v16  ;;  %5568 = vmatprep.mubr.f32.mxu0 %v7423_v16 }
 0x26f   : > { %v5494_v55 = vsel %vm464_vm2, %v5486_v0, %v5488_v11 }
 0x270   : > { %5504 = vmatprep.subr.mxu0 %v5494_v55 }
 0x271   : > { %v5490_v59 = vpop.permute.xlu0 %5489 }
 0x272   : > { %v5495_v39 = vsel %vm464_vm2, %v5488_v11, %v5490_v59  ;;  %v5492_v13 = vpop.permute.xlu1 %5491 }
 0x273   : > { %v5496_v24 = vsel %vm464_vm2, %v5490_v59, %v5492_v13 }
 0x274   : > { %5575 = vmatprep.subr.mxu1 %v5496_v24 }
 0x275   : > { %5576 = vmatpush1.msra.mxu1 %v5495_v39  ;;  %v5484_v30 = vpop.permute.xlu0 %5483 }
 0x276   : > { %v5493_v58 = vsel %vm464_vm2, %v5484_v30, %v5486_v0  ;;  %5820 = vmatmul.mubr.msk.f32.vlgmr.msra.gmra.mrb[2].mxu1 %vm502_vm0, %v5818_v32 }
 0x277   : > { %5505 = vmatpush1.msra.mxu0 %v5493_v58 }
 0x278   : > { %5819 = vmatmul.mubr.msk.f32.vlgmr.msra.gmra.mrb[2].mxu0 %vm502_vm0, %v5818_v32 }
 0x284   : > { %v5654_v16 = vpop.permute.xlu1 %5653 }
 0x349   : > { %v5641_v17 = vpop.f32.mrb[2].mxu1 }
 0x34a   : > { %v5658_v18 = vadd.f32 %v5654_v16, %v5641_v17  ;;  %v5643_v15 = vpop.f32.mrb[3].mxu1 }
 0x34b   : > { %v5659_v8 = vadd.f32 %v5654_v16, %v5643_v15  ;;  %v5570_v33 = vpop.f32.mrb[2].mxu0 }
 0x34c   : > { %5662 = vst [vmem:[%s251_s25 + $0x10] sm:$0xff] %v5658_v18  ;;  %v5656_v49 = vadd.f32 %v5654_v16, %v5570_v33  ;;  %v5572_v36 = vpop.f32.mrb[3].mxu0 }
 0x34d   : > { %5663 = vst [vmem:[%s251_s25 + $0x18] sm:$0xff] %v5659_v8  ;;  %v5657_v20 = vadd.f32 %v5654_v16, %v5572_v36 }
 0x34e   : > { %5660 = vst [vmem:[%s251_s25] sm:$0xff] %v5656_v49 }
 0x34f   : > { %5661 = vst [vmem:[%s251_s25 + $0x8] sm:$0xff] %v5657_v20 }
 0x350 PF: > { %s16_s21 = sadd.s32 1, %s5966_s21  }
 0x351   : > { %p13_p4 = scmp.ge.s32.totalorder %s16_s21, 4  }
 0x353   :  { %15 = sbr.rel (!%p13_p4) target bundleno = 1 (0x1), region = 107 }

</bundles_post_ra>
